<compile_context>
chip_gen: v7x
topology: tpu7x:2x2x1
jax: 0.10.0
libtpu: 0.0.40
codegen_flags: <defaults>
</compile_context>

<pallas_src>
import functools
import math

import jax
import jax.numpy as jnp
from jax import lax
from jax.experimental import pallas as pl
from jax.experimental.pallas import tpu as pltpu


# ----------------------------------------------------------------------------
# Fused estimator kernel (one grid step == one batch element, full time extent)
# ----------------------------------------------------------------------------
def _estimator_kernel(x_ref, enc_ref, m_ref, temb_ref,
                      w1x_ref, w1e_ref, b1_ref, g1_ref, be1_ref,
                      w2_ref, b2_ref, g2_ref, be2_ref,
                      wp_ref, bp_ref, o_ref, *, eps, k_size):
    T = x_ref.shape[1]
    F = temb_ref.shape[1]
    P = (k_size - 1) // 2  # 'same' padding

    m = m_ref[0].astype(jnp.float32)            # (T, 1)
    xm = x_ref[0].astype(jnp.float32) * m        # (T, 1)   noise channel * mask
    em = enc_ref[0].astype(jnp.float32) * m      # (T, Ce)  encoder channels * mask
    temb = temb_ref[...].astype(jnp.float32)     # (1, F)

    def pad_time(v):
        # zero-pad the time (sublane) axis by P on both sides
        if P == 0:
            return v
        z = jnp.zeros((P, v.shape[1]), jnp.float32)
        return jnp.concatenate([z, v, z], axis=0)

    def layer_norm(h, g_ref, b_ref):
        # single-pass mean/var over the channel (lane) axis
        inv_f = 1.0 / F
        mean = jnp.sum(h, axis=-1, keepdims=True) * inv_f
        meansq = jnp.sum(h * h, axis=-1, keepdims=True) * inv_f
        var = meansq - mean * mean
        hhat = (h - mean) * lax.rsqrt(var + eps)
        return hhat * g_ref[...].astype(jnp.float32) + b_ref[...].astype(jnp.float32)

    # ---- conv_1 over concat([x, enc]) (split into noise + encoder taps) ----
    xp = pad_time(xm)            # (T + 2P, 1)
    ep = pad_time(em)            # (T + 2P, Ce)
    h = jnp.zeros((T, F), jnp.float32)
    for k in range(k_size):      # static unroll over conv taps
        h = h + xp[k:k + T, :] * w1x_ref[k].astype(jnp.float32)        # (T,1)*(1,F)
        h = h + jnp.dot(ep[k:k + T, :], w1e_ref[k].astype(jnp.float32),
                        preferred_element_type=jnp.float32)            # (T,Ce)@(Ce,F)
    h = h + b1_ref[...].astype(jnp.float32)
    h = jnp.maximum(h, 0.0)
    h = h + temb
    h = layer_norm(h, g1_ref, be1_ref)
    # dropout: identity at inference

    # ---- conv_2 ----
    hp = pad_time(h * m)         # (T + 2P, F)
    h2 = jnp.zeros((T, F), jnp.float32)
    for k in range(k_size):
        h2 = h2 + jnp.dot(hp[k:k + T, :], w2_ref[k].astype(jnp.float32),
                          preferred_element_type=jnp.float32)          # (T,F)@(F,F)
    h2 = h2 + b2_ref[...].astype(jnp.float32)
    h2 = jnp.maximum(h2, 0.0)
    h2 = h2 + temb
    h2 = layer_norm(h2, g2_ref, be2_ref)

    # ---- 1x1 projection + final mask ----
    out = jnp.dot(h2 * m, wp_ref[...].astype(jnp.float32),
                  preferred_element_type=jnp.float32)                  # (T, 1)
    out = (out + bp_ref[...].astype(jnp.float32)) * m
    o_ref[0] = out.astype(o_ref.dtype)


def _vmem_limit_bytes(T, Ce, F, K):
    # Per-grid-step activation block bytes (f32): x + enc + mask + out.
    act = 4 * T * (Ce + 3)
    # Parameter blocks (constant index_map -> fetched once): convs / norms / proj / t_emb.
    wts = 4 * (K * ((Ce + 1) * F + F * F) + 8 * F + 2)
    # In-kernel temporaries (padded slabs + two (T, F) intermediates), generous.
    tmp = 4 * 6 * T * max(F, Ce + 1)
    need = 2 * act + wts + tmp            # x2 for the double-buffered input pipeline
    # Explicit limit with headroom; stay well under v7x's 64 MiB physical VMEM.
    return int(min(max(need + (8 << 20), 32 << 20), 56 << 20))


def estimator_pallas(x_bt1, enc_btc, mask_bt1, temb_1f, kp, *, eps):
    """Fused duration-predictor estimator. Inputs in (B, T, C) layout; output (B, T, 1)."""
    B, T, _ = x_bt1.shape
    Ce = enc_btc.shape[-1]
    F = temb_1f.shape[-1]
    K = kp["w1x"].shape[0]

    kernel = functools.partial(_estimator_kernel, eps=eps, k_size=K)
    return pl.pallas_call(
        kernel,
        out_shape=jax.ShapeDtypeStruct((B, T, 1), x_bt1.dtype),
        grid_spec=pltpu.PrefetchScalarGridSpec(
            num_scalar_prefetch=0,
            grid=(B,),
            in_specs=[
                pl.BlockSpec((1, T, 1), lambda b: (b, 0, 0)),      # x (noise channel)
                pl.BlockSpec((1, T, Ce), lambda b: (b, 0, 0)),     # enc_outputs
                pl.BlockSpec((1, T, 1), lambda b: (b, 0, 0)),      # mask
                pl.BlockSpec((1, F), lambda b: (0, 0)),            # t_emb (lane-dense row)
                pl.BlockSpec((K, 1, F), lambda b: (0, 0, 0)),      # conv1 taps (noise ch)
                pl.BlockSpec((K, Ce, F), lambda b: (0, 0, 0)),     # conv1 taps (enc chans)
                pl.BlockSpec((1, F), lambda b: (0, 0)),            # conv1 bias
                pl.BlockSpec((1, F), lambda b: (0, 0)),            # norm1 gamma
                pl.BlockSpec((1, F), lambda b: (0, 0)),            # norm1 beta
                pl.BlockSpec((K, F, F), lambda b: (0, 0, 0)),      # conv2 taps
                pl.BlockSpec((1, F), lambda b: (0, 0)),            # conv2 bias
                pl.BlockSpec((1, F), lambda b: (0, 0)),            # norm2 gamma
                pl.BlockSpec((1, F), lambda b: (0, 0)),            # norm2 beta
                pl.BlockSpec((F, 1), lambda b: (0, 0)),            # proj weight
                pl.BlockSpec((1, 1), lambda b: (0, 0)),            # proj bias
            ],
            out_specs=pl.BlockSpec((1, T, 1), lambda b: (b, 0, 0)),
        ),
        compiler_params=pltpu.CompilerParams(
            dimension_semantics=("parallel",),
            vmem_limit_bytes=_vmem_limit_bytes(T, Ce, F, K),
        ),
    )(x_bt1, enc_btc, mask_bt1, temb_1f,
      kp["w1x"], kp["w1e"], kp["b1"], kp["g1"], kp["be1"],
      kp["w2"], kp["b2"], kp["g2"], kp["be2"],
      kp["wp"], kp["bp"])


def _prep_kernel_params(p):
    """Re-layout PyTorch-convention weights for the (time, channel) kernel layout."""
    return dict(
        w1x=jnp.transpose(p["w1"][:, :1, :], (2, 1, 0)),   # (K, 1, F)
        w1e=jnp.transpose(p["w1"][:, 1:, :], (2, 1, 0)),   # (K, Ce, F)
        b1=p["b1"][None, :],
        g1=p["g1"][None, :], be1=p["be1"][None, :],
        w2=jnp.transpose(p["w2"], (2, 1, 0)),               # (K, F, F)
        b2=p["b2"][None, :],
        g2=p["g2"][None, :], be2=p["be2"][None, :],
        wp=p["wp"][0, :, 0][:, None],                        # (F, 1)
        bp=p["bp"].reshape(1, 1),                            # (1, 1)
    )


# ----------------------------------------------------------------------------
# Time-embedding MLP (SinusoidalPosEmb + TimestepEmbedding)
# TODO(synk): this is a per-Euler-step scalar-sized MLP; kept in plain JAX rather
# than a dedicated Pallas kernel (its cost is negligible next to the estimator).
# ----------------------------------------------------------------------------
def _time_mlp(t_scalar, params, scale=1000.0):
    wt1 = params["wt1"]
    F = wt1.shape[0]
    half = F // 2
    c = math.log(10000.0) / (half - 1)
    freqs = jnp.exp(jnp.arange(half, dtype=jnp.float32) * -c)
    tv = jnp.reshape(jnp.asarray(t_scalar, jnp.float32), (1, 1))
    arg = scale * tv * freqs[None, :]
    emb = jnp.concatenate([jnp.sin(arg), jnp.cos(arg)], axis=-1)   # (1, F)
    h = emb @ wt1.T + params["bt1"][None, :]
    h = h * jax.nn.sigmoid(h)                                      # SiLU
    h = h @ params["wt2"].T + params["bt2"][None, :]
    return h                                                       # (1, F)


# ----------------------------------------------------------------------------
# FlowMatchingDurationPrediction.forward (Euler solver) — Pallas path
# ----------------------------------------------------------------------------
@functools.partial(jax.jit, static_argnames=("n_timesteps", "eps"))
def solve_euler_pallas(z_nct, enc_nct, mask_nct, params, n_timesteps, eps):
    B, _, T = z_nct.shape
    kp = _prep_kernel_params(params)
    enc_btc = jnp.transpose(enc_nct, (0, 2, 1))      # NCT -> (B, T, C), done once
    mask_bt1 = jnp.reshape(mask_nct, (B, T, 1))
    x = jnp.reshape(z_nct, (B, T, 1))

    t_span = jnp.linspace(0.0, 1.0, n_timesteps + 1, dtype=jnp.float32)
    t = t_span[0]
    dt = t_span[1] - t_span[0]
    for step in range(1, n_timesteps + 1):
        temb = _time_mlp(t, params)
        dphi_dt = estimator_pallas(x, enc_btc, mask_bt1, temb, kp, eps=eps)
        x = x + dt * dphi_dt
        t = t + dt
        if step < n_timesteps:
            dt = t_span[step + 1] - t
    return jnp.reshape(x, (B, 1, T))                 # back to NCT like the module


# ----------------------------------------------------------------------------
# Pure-JAX reference mirroring the PyTorch module (for correctness checking)
# ----------------------------------------------------------------------------
def _layer_norm_ref(x, gamma, beta, eps):
    mean = jnp.mean(x, axis=1, keepdims=True)
    var = jnp.mean((x - mean) ** 2, axis=1, keepdims=True)
    xh = (x - mean) * lax.rsqrt(var + eps)
    return xh * gamma[None, :, None] + beta[None, :, None]


def _conv1d_ref(x, w, b, pad):
    out = lax.conv_general_dilated(x, w, window_strides=(1,), padding=[(pad, pad)],
                                   dimension_numbers=("NCH", "OIH", "NCH"))
    return out + b[None, :, None]


def _estimator_ref(x, mask, enc, t_scalar, params, eps):
    temb = _time_mlp(t_scalar, params)[:, :, None]       # (1, F, 1)
    P = (params["w1"].shape[-1] - 1) // 2
    xc = jnp.concatenate([x, enc], axis=1)
    h = _conv1d_ref(xc * mask, params["w1"], params["b1"], P)
    h = jnp.maximum(h, 0.0) + temb
    h = _layer_norm_ref(h, params["g1"], params["be1"], eps)
    h = _conv1d_ref(h * mask, params["w2"], params["b2"], P)
    h = jnp.maximum(h, 0.0) + temb
    h = _layer_norm_ref(h, params["g2"], params["be2"], eps)
    out = _conv1d_ref(h * mask, params["wp"], params["bp"], 0)
    return out * mask


@functools.partial(jax.jit, static_argnames=("n_timesteps", "eps"))
def solve_euler_ref(z_nct, enc_nct, mask_nct, params, n_timesteps, eps):
    t_span = jnp.linspace(0.0, 1.0, n_timesteps + 1, dtype=jnp.float32)
    x = z_nct
    t = t_span[0]
    dt = t_span[1] - t_span[0]
    for step in range(1, n_timesteps + 1):
        dphi_dt = _estimator_ref(x, mask_nct, enc_nct, t, params, eps)
        x = x + dt * dphi_dt
        t = t + dt
        if step < n_timesteps:
            dt = t_span[step + 1] - t
    return x


# ----------------------------------------------------------------------------
if __name__ == "__main__":
    B, Cenc, T = 2, 16, 96       # batch, encoder feats, time frames (T not a multiple of 128)
    F, K = 32, 3                 # filter_size, kernel_size
    n_steps = 4                  # Euler steps
    eps = 1e-4                   # FastPitch LayerNorm default
    Cin = 1 + Cenc

    key = jax.random.PRNGKey(0)
    k = jax.random.split(key, 10)

    def nrm(kk, shape, scale):
        return scale * jax.random.normal(kk, shape, dtype=jnp.float32)

    params = dict(
        w1=nrm(k[0], (F, Cin, K), 1.0 / math.sqrt(Cin * K)),
        b1=nrm(k[1], (F,), 0.1),
        g1=jnp.ones((F,), jnp.float32), be1=jnp.zeros((F,), jnp.float32),
        w2=nrm(k[2], (F, F, K), 1.0 / math.sqrt(F * K)),
        b2=nrm(k[3], (F,), 0.1),
        g2=jnp.ones((F,), jnp.float32), be2=jnp.zeros((F,), jnp.float32),
        wp=nrm(k[4], (1, F, 1), 1.0 / math.sqrt(F)),
        bp=jnp.zeros((1,), jnp.float32),
        wt1=nrm(k[5], (F, F), 1.0 / math.sqrt(F)),
        bt1=jnp.zeros((F,), jnp.float32),
        wt2=nrm(k[6], (F, F), 1.0 / math.sqrt(F)),
        bt2=jnp.zeros((F,), jnp.float32),
    )

    enc_outputs = jax.random.normal(k[7], (B, Cenc, T), dtype=jnp.float32)
    lengths = jnp.array([T, (3 * T) // 4], dtype=jnp.int32)
    mask = (jnp.arange(T)[None, None, :] < lengths[:, None, None]).astype(jnp.float32)

    temperature = 1.0
    z = jax.random.normal(k[8], (B, 1, T), dtype=jnp.float32) * temperature

    out = solve_euler_pallas(z, enc_outputs, mask, params, n_timesteps=n_steps, eps=eps)
    out = jax.block_until_ready(out)

    ref = solve_euler_ref(z, enc_outputs, mask, params, n_timesteps=n_steps, eps=eps)
    ref = jax.block_until_ready(ref)

    assert out.shape == (B, 1, T)
    assert jnp.allclose(out, ref, atol=2e-4, rtol=2e-4), \
        f"max abs diff = {float(jnp.max(jnp.abs(out - ref)))}"
    print("KERNEL_OK")
</pallas_src>

<mosaic_0001>
module attributes {stable_mosaic.version = 11 : i64} {
  func.func @_estimator_kernel(%arg0: i32, %arg1: memref<1x96x1xf32, #tpu.memory_space<vmem>>, %arg2: memref<1x96x16xf32, #tpu.memory_space<vmem>>, %arg3: memref<1x96x1xf32, #tpu.memory_space<vmem>>, %arg4: memref<1x32xf32, #tpu.memory_space<vmem>>, %arg5: memref<3x1x32xf32, #tpu.memory_space<vmem>>, %arg6: memref<3x16x32xf32, #tpu.memory_space<vmem>>, %arg7: memref<1x32xf32, #tpu.memory_space<vmem>>, %arg8: memref<1x32xf32, #tpu.memory_space<vmem>>, %arg9: memref<1x32xf32, #tpu.memory_space<vmem>>, %arg10: memref<3x32x32xf32, #tpu.memory_space<vmem>>, %arg11: memref<1x32xf32, #tpu.memory_space<vmem>>, %arg12: memref<1x32xf32, #tpu.memory_space<vmem>>, %arg13: memref<1x32xf32, #tpu.memory_space<vmem>>, %arg14: memref<32x1xf32, #tpu.memory_space<vmem>>, %arg15: memref<1x1xf32, #tpu.memory_space<vmem>>, %arg16: memref<1x96x1xf32, #tpu.memory_space<vmem>>) attributes {dimension_semantics = [#tpu.dimension_semantics<parallel>], iteration_bounds = array<i64: 2>, scalar_prefetch = 0 : i64, scratch_operands = 0 : i64, tpu.core_type = #tpu.core_type<tc>, window_params = [{transform_indices = @transform_0, window_bounds = array<i64: 1, 96, 1>}, {transform_indices = @transform_1, window_bounds = array<i64: 1, 96, 16>}, {transform_indices = @transform_2, window_bounds = array<i64: 1, 96, 1>}, {pipeline_mode = #tpu.pipeline_mode<synchronous>, transform_indices = @transform_3, window_bounds = array<i64: 1, 32>}, {pipeline_mode = #tpu.pipeline_mode<synchronous>, transform_indices = @transform_4, window_bounds = array<i64: 3, 1, 32>}, {pipeline_mode = #tpu.pipeline_mode<synchronous>, transform_indices = @transform_5, window_bounds = array<i64: 3, 16, 32>}, {pipeline_mode = #tpu.pipeline_mode<synchronous>, transform_indices = @transform_6, window_bounds = array<i64: 1, 32>}, {pipeline_mode = #tpu.pipeline_mode<synchronous>, transform_indices = @transform_7, window_bounds = array<i64: 1, 32>}, {pipeline_mode = #tpu.pipeline_mode<synchronous>, transform_indices = @transform_8, window_bounds = array<i64: 1, 32>}, {pipeline_mode = #tpu.pipeline_mode<synchronous>, transform_indices = @transform_9, window_bounds = array<i64: 3, 32, 32>}, {pipeline_mode = #tpu.pipeline_mode<synchronous>, transform_indices = @transform_10, window_bounds = array<i64: 1, 32>}, {pipeline_mode = #tpu.pipeline_mode<synchronous>, transform_indices = @transform_11, window_bounds = array<i64: 1, 32>}, {pipeline_mode = #tpu.pipeline_mode<synchronous>, transform_indices = @transform_12, window_bounds = array<i64: 1, 32>}, {pipeline_mode = #tpu.pipeline_mode<synchronous>, transform_indices = @transform_13, window_bounds = array<i64: 32, 1>}, {pipeline_mode = #tpu.pipeline_mode<synchronous>, transform_indices = @transform_14, window_bounds = array<i64: 1, 1>}, {transform_indices = @transform_15, window_bounds = array<i64: 1, 96, 1>}]} {
    %c0 = arith.constant 0 : index
    %c0_0 = arith.constant 0 : index
    %c0_1 = arith.constant 0 : index
    %0 = vector.load %arg3[%c0, %c0_0, %c0_1] : memref<1x96x1xf32, #tpu.memory_space<vmem>>, vector<1x96x1xf32>
    %1 = vector.shape_cast %0 : vector<1x96x1xf32> to vector<96x1xf32>
    %c0_2 = arith.constant 0 : index
    %c0_3 = arith.constant 0 : index
    %c0_4 = arith.constant 0 : index
    %2 = vector.load %arg1[%c0_2, %c0_3, %c0_4] : memref<1x96x1xf32, #tpu.memory_space<vmem>>, vector<1x96x1xf32>
    %3 = vector.shape_cast %2 : vector<1x96x1xf32> to vector<96x1xf32>
    %4 = arith.mulf %3, %1 : vector<96x1xf32>
    %c0_5 = arith.constant 0 : index
    %c0_6 = arith.constant 0 : index
    %c0_7 = arith.constant 0 : index
    %5 = vector.load %arg2[%c0_5, %c0_6, %c0_7] : memref<1x96x16xf32, #tpu.memory_space<vmem>>, vector<1x96x16xf32>
    %6 = vector.shape_cast %5 : vector<1x96x16xf32> to vector<96x16xf32>
    %7 = vector.broadcast %1 : vector<96x1xf32> to vector<96x16xf32>
    %8 = arith.mulf %6, %7 : vector<96x16xf32>
    %c0_8 = arith.constant 0 : index
    %c0_9 = arith.constant 0 : index
    %9 = vector.load %arg4[%c0_8, %c0_9] : memref<1x32xf32, #tpu.memory_space<vmem>>, vector<1x32xf32>
    %cst = arith.constant 0.000000e+00 : f32
    %10 = vector.broadcast %cst : f32 to vector<1x1xf32>
    %11 = tpu.concatenate %10, %4, %10 in 0 : vector<1x1xf32>, vector<96x1xf32>, vector<1x1xf32> -> vector<98x1xf32>
    %cst_10 = arith.constant 0.000000e+00 : f32
    %12 = vector.broadcast %cst_10 : f32 to vector<1x16xf32>
    %13 = tpu.concatenate %12, %8, %12 in 0 : vector<1x16xf32>, vector<96x16xf32>, vector<1x16xf32> -> vector<98x16xf32>
    %cst_11 = arith.constant 0.000000e+00 : f32
    %14 = vector.broadcast %cst_11 : f32 to vector<96x32xf32>
    %15 = vector.extract_strided_slice %11 {offsets = [0, 0], sizes = [96, 1], strides = [1, 1]} : vector<98x1xf32> to vector<96x1xf32>
    %c0_12 = arith.constant 0 : index
    %c0_13 = arith.constant 0 : index
    %c0_14 = arith.constant 0 : index
    %16 = vector.load %arg5[%c0_12, %c0_13, %c0_14] : memref<3x1x32xf32, #tpu.memory_space<vmem>>, vector<1x1x32xf32>
    %17 = vector.shape_cast %16 : vector<1x1x32xf32> to vector<1x32xf32>
    %18 = vector.broadcast %15 : vector<96x1xf32> to vector<96x32xf32>
    %19 = vector.broadcast %17 : vector<1x32xf32> to vector<96x32xf32>
    %20 = arith.mulf %18, %19 : vector<96x32xf32>
    %21 = arith.addf %14, %20 : vector<96x32xf32>
    %22 = vector.extract_strided_slice %13 {offsets = [0, 0], sizes = [96, 16], strides = [1, 1]} : vector<98x16xf32> to vector<96x16xf32>
    %c0_15 = arith.constant 0 : index
    %c0_16 = arith.constant 0 : index
    %c0_17 = arith.constant 0 : index
    %23 = vector.load %arg6[%c0_15, %c0_16, %c0_17] : memref<3x16x32xf32, #tpu.memory_space<vmem>>, vector<1x16x32xf32>
    %24 = vector.shape_cast %23 : vector<1x16x32xf32> to vector<16x32xf32>
    %cst_18 = arith.constant dense<0.000000e+00> : vector<96x32xf32>
    %25 = tpu.matmul %22, %24, %cst_18 {dimension_numbers = #tpu.dot_dimension_numbers<[1], [0], [0], [1], [0, 0, 1, 1], [], []>} : vector<96x16xf32>, vector<16x32xf32>, vector<96x32xf32> -> vector<96x32xf32>
    %26 = arith.addf %21, %25 : vector<96x32xf32>
    %27 = vector.extract_strided_slice %11 {offsets = [1, 0], sizes = [96, 1], strides = [1, 1]} : vector<98x1xf32> to vector<96x1xf32>
    %c1 = arith.constant 1 : index
    %c0_19 = arith.constant 0 : index
    %c0_20 = arith.constant 0 : index
    %28 = vector.load %arg5[%c1, %c0_19, %c0_20] : memref<3x1x32xf32, #tpu.memory_space<vmem>>, vector<1x1x32xf32>
    %29 = vector.shape_cast %28 : vector<1x1x32xf32> to vector<1x32xf32>
    %30 = vector.broadcast %27 : vector<96x1xf32> to vector<96x32xf32>
    %31 = vector.broadcast %29 : vector<1x32xf32> to vector<96x32xf32>
    %32 = arith.mulf %30, %31 : vector<96x32xf32>
    %33 = arith.addf %26, %32 : vector<96x32xf32>
    %34 = vector.extract_strided_slice %13 {offsets = [1, 0], sizes = [96, 16], strides = [1, 1]} : vector<98x16xf32> to vector<96x16xf32>
    %c1_21 = arith.constant 1 : index
    %c0_22 = arith.constant 0 : index
    %c0_23 = arith.constant 0 : index
    %35 = vector.load %arg6[%c1_21, %c0_22, %c0_23] : memref<3x16x32xf32, #tpu.memory_space<vmem>>, vector<1x16x32xf32>
    %36 = vector.shape_cast %35 : vector<1x16x32xf32> to vector<16x32xf32>
    %cst_24 = arith.constant dense<0.000000e+00> : vector<96x32xf32>
    %37 = tpu.matmul %34, %36, %cst_24 {dimension_numbers = #tpu.dot_dimension_numbers<[1], [0], [0], [1], [0, 0, 1, 1], [], []>} : vector<96x16xf32>, vector<16x32xf32>, vector<96x32xf32> -> vector<96x32xf32>
    %38 = arith.addf %33, %37 : vector<96x32xf32>
    %39 = vector.extract_strided_slice %11 {offsets = [2, 0], sizes = [96, 1], strides = [1, 1]} : vector<98x1xf32> to vector<96x1xf32>
    %c2 = arith.constant 2 : index
    %c0_25 = arith.constant 0 : index
    %c0_26 = arith.constant 0 : index
    %40 = vector.load %arg5[%c2, %c0_25, %c0_26] : memref<3x1x32xf32, #tpu.memory_space<vmem>>, vector<1x1x32xf32>
    %41 = vector.shape_cast %40 : vector<1x1x32xf32> to vector<1x32xf32>
    %42 = vector.broadcast %39 : vector<96x1xf32> to vector<96x32xf32>
    %43 = vector.broadcast %41 : vector<1x32xf32> to vector<96x32xf32>
    %44 = arith.mulf %42, %43 : vector<96x32xf32>
    %45 = arith.addf %38, %44 : vector<96x32xf32>
    %46 = vector.extract_strided_slice %13 {offsets = [2, 0], sizes = [96, 16], strides = [1, 1]} : vector<98x16xf32> to vector<96x16xf32>
    %c2_27 = arith.constant 2 : index
    %c0_28 = arith.constant 0 : index
    %c0_29 = arith.constant 0 : index
    %47 = vector.load %arg6[%c2_27, %c0_28, %c0_29] : memref<3x16x32xf32, #tpu.memory_space<vmem>>, vector<1x16x32xf32>
    %48 = vector.shape_cast %47 : vector<1x16x32xf32> to vector<16x32xf32>
    %cst_30 = arith.constant dense<0.000000e+00> : vector<96x32xf32>
    %49 = tpu.matmul %46, %48, %cst_30 {dimension_numbers = #tpu.dot_dimension_numbers<[1], [0], [0], [1], [0, 0, 1, 1], [], []>} : vector<96x16xf32>, vector<16x32xf32>, vector<96x32xf32> -> vector<96x32xf32>
    %50 = arith.addf %45, %49 : vector<96x32xf32>
    %c0_31 = arith.constant 0 : index
    %c0_32 = arith.constant 0 : index
    %51 = vector.load %arg7[%c0_31, %c0_32] : memref<1x32xf32, #tpu.memory_space<vmem>>, vector<1x32xf32>
    %52 = vector.broadcast %51 : vector<1x32xf32> to vector<96x32xf32>
    %53 = arith.addf %50, %52 : vector<96x32xf32>
    %cst_33 = arith.constant 0.000000e+00 : f32
    %54 = vector.broadcast %cst_33 : f32 to vector<96x32xf32>
    %55 = arith.maximumf %53, %54 : vector<96x32xf32>
    %56 = vector.broadcast %9 : vector<1x32xf32> to vector<96x32xf32>
    %57 = arith.addf %55, %56 : vector<96x32xf32>
    %cst_34 = arith.constant dense<0.000000e+00> : vector<96xf32>
    %58 = vector.multi_reduction <add>, %57, %cst_34 [1] : vector<96x32xf32> to vector<96xf32>
    %59 = vector.shape_cast %58 : vector<96xf32> to vector<96x1xf32>
    %cst_35 = arith.constant 3.125000e-02 : f32
    %60 = vector.broadcast %cst_35 : f32 to vector<96x1xf32>
    %61 = arith.mulf %59, %60 : vector<96x1xf32>
    %62 = arith.mulf %57, %57 : vector<96x32xf32>
    %cst_36 = arith.constant dense<0.000000e+00> : vector<96xf32>
    %63 = vector.multi_reduction <add>, %62, %cst_36 [1] : vector<96x32xf32> to vector<96xf32>
    %64 = vector.shape_cast %63 : vector<96xf32> to vector<96x1xf32>
    %cst_37 = arith.constant 3.125000e-02 : f32
    %65 = vector.broadcast %cst_37 : f32 to vector<96x1xf32>
    %66 = arith.mulf %64, %65 : vector<96x1xf32>
    %67 = arith.mulf %61, %61 : vector<96x1xf32>
    %68 = arith.subf %66, %67 : vector<96x1xf32>
    %69 = vector.broadcast %61 : vector<96x1xf32> to vector<96x32xf32>
    %70 = arith.subf %57, %69 : vector<96x32xf32>
    %cst_38 = arith.constant 9.99999974E-5 : f32
    %71 = vector.broadcast %cst_38 : f32 to vector<96x1xf32>
    %72 = arith.addf %68, %71 : vector<96x1xf32>
    %73 = math.rsqrt %72 : vector<96x1xf32>
    %74 = vector.broadcast %73 : vector<96x1xf32> to vector<96x32xf32>
    %75 = arith.mulf %70, %74 : vector<96x32xf32>
    %c0_39 = arith.constant 0 : index
    %c0_40 = arith.constant 0 : index
    %76 = vector.load %arg8[%c0_39, %c0_40] : memref<1x32xf32, #tpu.memory_space<vmem>>, vector<1x32xf32>
    %77 = vector.broadcast %76 : vector<1x32xf32> to vector<96x32xf32>
    %78 = arith.mulf %75, %77 : vector<96x32xf32>
    %c0_41 = arith.constant 0 : index
    %c0_42 = arith.constant 0 : index
    %79 = vector.load %arg9[%c0_41, %c0_42] : memref<1x32xf32, #tpu.memory_space<vmem>>, vector<1x32xf32>
    %80 = vector.broadcast %79 : vector<1x32xf32> to vector<96x32xf32>
    %81 = arith.addf %78, %80 : vector<96x32xf32>
    %82 = vector.broadcast %1 : vector<96x1xf32> to vector<96x32xf32>
    %83 = arith.mulf %81, %82 : vector<96x32xf32>
    %cst_43 = arith.constant 0.000000e+00 : f32
    %84 = vector.broadcast %cst_43 : f32 to vector<1x32xf32>
    %85 = tpu.concatenate %84, %83, %84 in 0 : vector<1x32xf32>, vector<96x32xf32>, vector<1x32xf32> -> vector<98x32xf32>
    %cst_44 = arith.constant 0.000000e+00 : f32
    %86 = vector.broadcast %cst_44 : f32 to vector<96x32xf32>
    %87 = vector.extract_strided_slice %85 {offsets = [0, 0], sizes = [96, 32], strides = [1, 1]} : vector<98x32xf32> to vector<96x32xf32>
    %c0_45 = arith.constant 0 : index
    %c0_46 = arith.constant 0 : index
    %c0_47 = arith.constant 0 : index
    %88 = vector.load %arg10[%c0_45, %c0_46, %c0_47] : memref<3x32x32xf32, #tpu.memory_space<vmem>>, vector<1x32x32xf32>
    %89 = vector.shape_cast %88 : vector<1x32x32xf32> to vector<32x32xf32>
    %cst_48 = arith.constant dense<0.000000e+00> : vector<96x32xf32>
    %90 = tpu.matmul %87, %89, %cst_48 {dimension_numbers = #tpu.dot_dimension_numbers<[1], [0], [0], [1], [0, 0, 1, 1], [], []>} : vector<96x32xf32>, vector<32x32xf32>, vector<96x32xf32> -> vector<96x32xf32>
    %91 = arith.addf %86, %90 : vector<96x32xf32>
    %92 = vector.extract_strided_slice %85 {offsets = [1, 0], sizes = [96, 32], strides = [1, 1]} : vector<98x32xf32> to vector<96x32xf32>
    %c1_49 = arith.constant 1 : index
    %c0_50 = arith.constant 0 : index
    %c0_51 = arith.constant 0 : index
    %93 = vector.load %arg10[%c1_49, %c0_50, %c0_51] : memref<3x32x32xf32, #tpu.memory_space<vmem>>, vector<1x32x32xf32>
    %94 = vector.shape_cast %93 : vector<1x32x32xf32> to vector<32x32xf32>
    %cst_52 = arith.constant dense<0.000000e+00> : vector<96x32xf32>
    %95 = tpu.matmul %92, %94, %cst_52 {dimension_numbers = #tpu.dot_dimension_numbers<[1], [0], [0], [1], [0, 0, 1, 1], [], []>} : vector<96x32xf32>, vector<32x32xf32>, vector<96x32xf32> -> vector<96x32xf32>
    %96 = arith.addf %91, %95 : vector<96x32xf32>
    %97 = vector.extract_strided_slice %85 {offsets = [2, 0], sizes = [96, 32], strides = [1, 1]} : vector<98x32xf32> to vector<96x32xf32>
    %c2_53 = arith.constant 2 : index
    %c0_54 = arith.constant 0 : index
    %c0_55 = arith.constant 0 : index
    %98 = vector.load %arg10[%c2_53, %c0_54, %c0_55] : memref<3x32x32xf32, #tpu.memory_space<vmem>>, vector<1x32x32xf32>
    %99 = vector.shape_cast %98 : vector<1x32x32xf32> to vector<32x32xf32>
    %cst_56 = arith.constant dense<0.000000e+00> : vector<96x32xf32>
    %100 = tpu.matmul %97, %99, %cst_56 {dimension_numbers = #tpu.dot_dimension_numbers<[1], [0], [0], [1], [0, 0, 1, 1], [], []>} : vector<96x32xf32>, vector<32x32xf32>, vector<96x32xf32> -> vector<96x32xf32>
    %101 = arith.addf %96, %100 : vector<96x32xf32>
    %c0_57 = arith.constant 0 : index
    %c0_58 = arith.constant 0 : index
    %102 = vector.load %arg11[%c0_57, %c0_58] : memref<1x32xf32, #tpu.memory_space<vmem>>, vector<1x32xf32>
    %103 = vector.broadcast %102 : vector<1x32xf32> to vector<96x32xf32>
    %104 = arith.addf %101, %103 : vector<96x32xf32>
    %cst_59 = arith.constant 0.000000e+00 : f32
    %105 = vector.broadcast %cst_59 : f32 to vector<96x32xf32>
    %106 = arith.maximumf %104, %105 : vector<96x32xf32>
    %107 = vector.broadcast %9 : vector<1x32xf32> to vector<96x32xf32>
    %108 = arith.addf %106, %107 : vector<96x32xf32>
    %cst_60 = arith.constant dense<0.000000e+00> : vector<96xf32>
    %109 = vector.multi_reduction <add>, %108, %cst_60 [1] : vector<96x32xf32> to vector<96xf32>
    %110 = vector.shape_cast %109 : vector<96xf32> to vector<96x1xf32>
    %cst_61 = arith.constant 3.125000e-02 : f32
    %111 = vector.broadcast %cst_61 : f32 to vector<96x1xf32>
    %112 = arith.mulf %110, %111 : vector<96x1xf32>
    %113 = arith.mulf %108, %108 : vector<96x32xf32>
    %cst_62 = arith.constant dense<0.000000e+00> : vector<96xf32>
    %114 = vector.multi_reduction <add>, %113, %cst_62 [1] : vector<96x32xf32> to vector<96xf32>
    %115 = vector.shape_cast %114 : vector<96xf32> to vector<96x1xf32>
    %cst_63 = arith.constant 3.125000e-02 : f32
    %116 = vector.broadcast %cst_63 : f32 to vector<96x1xf32>
    %117 = arith.mulf %115, %116 : vector<96x1xf32>
    %118 = arith.mulf %112, %112 : vector<96x1xf32>
    %119 = arith.subf %117, %118 : vector<96x1xf32>
    %120 = vector.broadcast %112 : vector<96x1xf32> to vector<96x32xf32>
    %121 = arith.subf %108, %120 : vector<96x32xf32>
    %cst_64 = arith.constant 9.99999974E-5 : f32
    %122 = vector.broadcast %cst_64 : f32 to vector<96x1xf32>
    %123 = arith.addf %119, %122 : vector<96x1xf32>
    %124 = math.rsqrt %123 : vector<96x1xf32>
    %125 = vector.broadcast %124 : vector<96x1xf32> to vector<96x32xf32>
    %126 = arith.mulf %121, %125 : vector<96x32xf32>
    %c0_65 = arith.constant 0 : index
    %c0_66 = arith.constant 0 : index
    %127 = vector.load %arg12[%c0_65, %c0_66] : memref<1x32xf32, #tpu.memory_space<vmem>>, vector<1x32xf32>
    %128 = vector.broadcast %127 : vector<1x32xf32> to vector<96x32xf32>
    %129 = arith.mulf %126, %128 : vector<96x32xf32>
    %c0_67 = arith.constant 0 : index
    %c0_68 = arith.constant 0 : index
    %130 = vector.load %arg13[%c0_67, %c0_68] : memref<1x32xf32, #tpu.memory_space<vmem>>, vector<1x32xf32>
    %131 = vector.broadcast %130 : vector<1x32xf32> to vector<96x32xf32>
    %132 = arith.addf %129, %131 : vector<96x32xf32>
    %133 = vector.broadcast %1 : vector<96x1xf32> to vector<96x32xf32>
    %134 = arith.mulf %132, %133 : vector<96x32xf32>
    %c0_69 = arith.constant 0 : index
    %c0_70 = arith.constant 0 : index
    %135 = vector.load %arg14[%c0_69, %c0_70] : memref<32x1xf32, #tpu.memory_space<vmem>>, vector<32x1xf32>
    %cst_71 = arith.constant dense<0.000000e+00> : vector<96x1xf32>
    %136 = tpu.matmul %134, %135, %cst_71 {dimension_numbers = #tpu.dot_dimension_numbers<[1], [0], [0], [1], [0, 0, 1, 1], [], []>} : vector<96x32xf32>, vector<32x1xf32>, vector<96x1xf32> -> vector<96x1xf32>
    %c0_72 = arith.constant 0 : index
    %c0_73 = arith.constant 0 : index
    %137 = vector.load %arg15[%c0_72, %c0_73] : memref<1x1xf32, #tpu.memory_space<vmem>>, vector<1x1xf32>
    %138 = vector.broadcast %137 : vector<1x1xf32> to vector<96x1xf32>
    %139 = arith.addf %136, %138 : vector<96x1xf32>
    %140 = arith.mulf %139, %1 : vector<96x1xf32>
    %c0_74 = arith.constant 0 : index
    %c0_75 = arith.constant 0 : index
    %c0_76 = arith.constant 0 : index
    %141 = vector.load %arg16[%c0_74, %c0_75, %c0_76] : memref<1x96x1xf32, #tpu.memory_space<vmem>>, vector<1x96x1xf32>
    %142 = vector.shape_cast %141 : vector<1x96x1xf32> to vector<96x1xf32>
    %143 = vector.shape_cast %140 : vector<96x1xf32> to vector<1x96x1xf32>
    tpu.vector_store %arg16[%c0_74, %c0_75, %c0_76], %143 {strides = array<i32>} : memref<1x96x1xf32, #tpu.memory_space<vmem>>, vector<1x96x1xf32>,
    return
  }
  func.func @transform_0(%arg0: i32) -> (i32, i32, i32) {
    %c0_i32 = arith.constant 0 : i32
    %c0_i32_0 = arith.constant 0 : i32
    %c0_i32_1 = arith.constant 0 : i32
    return %arg0, %c0_i32, %c0_i32_0 : i32, i32, i32
  }
  func.func @transform_1(%arg0: i32) -> (i32, i32, i32) {
    %c0_i32 = arith.constant 0 : i32
    %c0_i32_0 = arith.constant 0 : i32
    %c0_i32_1 = arith.constant 0 : i32
    return %arg0, %c0_i32, %c0_i32_0 : i32, i32, i32
  }
  func.func @transform_2(%arg0: i32) -> (i32, i32, i32) {
    %c0_i32 = arith.constant 0 : i32
    %c0_i32_0 = arith.constant 0 : i32
    %c0_i32_1 = arith.constant 0 : i32
    return %arg0, %c0_i32, %c0_i32_0 : i32, i32, i32
  }
  func.func @transform_3(%arg0: i32) -> (i32, i32) {
    %c0_i32 = arith.constant 0 : i32
    %c0_i32_0 = arith.constant 0 : i32
    %c0_i32_1 = arith.constant 0 : i32
    return %c0_i32, %c0_i32_0 : i32, i32
  }
  func.func @transform_4(%arg0: i32) -> (i32, i32, i32) {
    %c0_i32 = arith.constant 0 : i32
    %c0_i32_0 = arith.constant 0 : i32
    %c0_i32_1 = arith.constant 0 : i32
    %c0_i32_2 = arith.constant 0 : i32
    return %c0_i32, %c0_i32_0, %c0_i32_1 : i32, i32, i32
  }
  func.func @transform_5(%arg0: i32) -> (i32, i32, i32) {
    %c0_i32 = arith.constant 0 : i32
    %c0_i32_0 = arith.constant 0 : i32
    %c0_i32_1 = arith.constant 0 : i32
    %c0_i32_2 = arith.constant 0 : i32
    return %c0_i32, %c0_i32_0, %c0_i32_1 : i32, i32, i32
  }
  func.func @transform_6(%arg0: i32) -> (i32, i32) {
    %c0_i32 = arith.constant 0 : i32
    %c0_i32_0 = arith.constant 0 : i32
    %c0_i32_1 = arith.constant 0 : i32
    return %c0_i32, %c0_i32_0 : i32, i32
  }
  func.func @transform_7(%arg0: i32) -> (i32, i32) {
    %c0_i32 = arith.constant 0 : i32
    %c0_i32_0 = arith.constant 0 : i32
    %c0_i32_1 = arith.constant 0 : i32
    return %c0_i32, %c0_i32_0 : i32, i32
  }
  func.func @transform_8(%arg0: i32) -> (i32, i32) {
    %c0_i32 = arith.constant 0 : i32
    %c0_i32_0 = arith.constant 0 : i32
    %c0_i32_1 = arith.constant 0 : i32
    return %c0_i32, %c0_i32_0 : i32, i32
  }
  func.func @transform_9(%arg0: i32) -> (i32, i32, i32) {
    %c0_i32 = arith.constant 0 : i32
    %c0_i32_0 = arith.constant 0 : i32
    %c0_i32_1 = arith.constant 0 : i32
    %c0_i32_2 = arith.constant 0 : i32
    return %c0_i32, %c0_i32_0, %c0_i32_1 : i32, i32, i32
  }
  func.func @transform_10(%arg0: i32) -> (i32, i32) {
    %c0_i32 = arith.constant 0 : i32
    %c0_i32_0 = arith.constant 0 : i32
    %c0_i32_1 = arith.constant 0 : i32
    return %c0_i32, %c0_i32_0 : i32, i32
  }
  func.func @transform_11(%arg0: i32) -> (i32, i32) {
    %c0_i32 = arith.constant 0 : i32
    %c0_i32_0 = arith.constant 0 : i32
    %c0_i32_1 = arith.constant 0 : i32
    return %c0_i32, %c0_i32_0 : i32, i32
  }
  func.func @transform_12(%arg0: i32) -> (i32, i32) {
    %c0_i32 = arith.constant 0 : i32
    %c0_i32_0 = arith.constant 0 : i32
    %c0_i32_1 = arith.constant 0 : i32
    return %c0_i32, %c0_i32_0 : i32, i32
  }
  func.func @transform_13(%arg0: i32) -> (i32, i32) {
    %c0_i32 = arith.constant 0 : i32
    %c0_i32_0 = arith.constant 0 : i32
    %c0_i32_1 = arith.constant 0 : i32
    return %c0_i32, %c0_i32_0 : i32, i32
  }
  func.func @transform_14(%arg0: i32) -> (i32, i32) {
    %c0_i32 = arith.constant 0 : i32
    %c0_i32_0 = arith.constant 0 : i32
    %c0_i32_1 = arith.constant 0 : i32
    return %c0_i32, %c0_i32_0 : i32, i32
  }
  func.func @transform_15(%arg0: i32) -> (i32, i32, i32) {
    %c0_i32 = arith.constant 0 : i32
    %c0_i32_0 = arith.constant 0 : i32
    %c0_i32_1 = arith.constant 0 : i32
    return %arg0, %c0_i32, %c0_i32_0 : i32, i32, i32
  }
}

</mosaic_0001>

<bundles_post_ra>
// kernel: solve_euler_pallas.4
= control target key start
LH: loop header
LB: loop body
LE: loop exit
PB: predicated region body
PF: predicated region fallthrough
CT: control target
= control target key end

     0   :  { %s3618_s20 = smov 0   ;;  %s4754_s0 = inlined_call_operand.vmem [shape: f32[2,96,1], index: 0, kind: input, shape index: {}]   ;;  %s4755_s1 = inlined_call_operand.vmem [shape: f32[2,96,16], index: 1, kind: input, shape index: {}]   ;;  %s4756_s2 = inlined_call_operand.vmem [shape: f32[2,96,1], index: 2, kind: input, shape index: {}]   ;;  %s4757_s3 = inlined_call_operand.vmem [shape: f32[1,32], index: 3, kind: input, shape index: {}]   ;;  %s4758_s4 = inlined_call_operand.vmem [shape: f32[3,1,32], index: 4, kind: input, shape index: {}]   ;;  %s4759_s5 = inlined_call_operand.vmem [shape: f32[3,16,32], index: 5, kind: input, shape index: {}]   ;;  %s4760_s6 = inlined_call_operand.vmem [shape: f32[1,32], index: 6, kind: input, shape index: {}]   ;;  %s4761_s7 = inlined_call_operand.vmem [shape: f32[1,32], index: 7, kind: input, shape index: {}]   ;;  %s4762_s8 = inlined_call_operand.vmem [shape: f32[1,32], index: 8, kind: input, shape index: {}]   ;;  %s4763_s9 = inlined_call_operand.vmem [shape: f32[3,32,32], index: 9, kind: input, shape index: {}]   ;;  %s4764_s10 = inlined_call_operand.vmem [shape: f32[1,32], index: 10, kind: input, shape index: {}]   ;;  %s4765_s11 = inlined_call_operand.vmem [shape: f32[1,32], index: 11, kind: input, shape index: {}]   ;;  %s4766_s12 = inlined_call_operand.vmem [shape: f32[1,32], index: 12, kind: input, shape index: {}]   ;;  %s4767_s13 = inlined_call_operand.vmem [shape: f32[32,1], index: 13, kind: input, shape index: {}]   ;;  %s4768_s14 = inlined_call_operand.<no memory space> [shape: f32[1,1], index: 14, kind: input, shape index: {}]   ;;  %s4769_s15 = inlined_call_operand.vmem [shape: f32[2,96,1], index: 15, kind: output, shape index: {}]  }
   0x1   :  { %v20_v0 = vstv %s4768_s14 }
   0x2   :  { %21 = vst [vmem:[#allocation2] sm:$0x1] %v20_v0 }
   0x3 LB: > { %s2927_s21 = sadd.s32 4294967295, %s3532_s20   ;;  %p2931_p0 = scmp.ge.s32.totalorder %s3532_s20, 1  ;;  %s3532_s20 = sphi %s3618_s20, %s27_s20  }
   0x4   : > { %p459_p1 = scmp.lt.s32.totalorder %s3532_s20, 3 }
   0x6   : > { %p460_p2 = pnand %p2931_p0, %p459_p1 }
   0x8   : > { %463 = sbr.rel (%p460_p2) target bundleno = 1314 (0x522), region = 80 }
   0xf   : > { %p517_p3 = scmp.lt.s32.totalorder %s2927_s21, 1  ;;  %v3534_v1 = vmov 0   ;;  %v817_v8 = vld [vmem:[%s4759_s5] sm:$0xff]  ;;  %v818_v9 = vld [vmem:[%s4759_s5 + $0x8] sm:$0xff]  ;;  %v2951_v15 = vld [vmem:[%s4759_s5 + $0x10] sm:$0xff]  ;;  %vm670_vm0 = vcmask 1040384  }
  0x10   : > { %3464 = vset.pattern.permute.xlu1 %v3534_v1  ;;  %3463 = vset.pattern.permute.xlu0 %v3534_v1  ;;  %v3323_v14 = vpack.c.bf16 %v818_v9, %v817_v8  ;;  %v2952_v16 = vld [vmem:[%s4759_s5 + $0x18] sm:$0xff]  ;;  %vm819_vm1 = vcmask 130048   ;;  %vm1021_vm2 = vcmask 1046528   ;;  %vm1295_vm3 = vcmask 1045504  }
  0x11   : > { %s4801_s21 = smov (!%p517_p3, %s2927_s21), 1  ;;  %v3662_v17 = vpack.c.bf16 %v2952_v16, %v2951_v15  ;;  %vm1583_vm4 = vcmask 261120   ;;  %vm2835_vm5 = vcmask 7168  }
  0x12   : > { %s3626_s14 = smul.u32 96, %s4801_s21  ;;  %3324 = vmatprep.subr.bf16.mxu0 %v3323_v14  ;;  %3367 = vmatprep.subr.bf16.mxu1 %v3323_v14 }
  0x13   : > { %3326 = vmatpush3.bf16.msra.mxu0 %v3323_v14  ;;  %3368 = vmatpush3.bf16.msra.mxu1 %v3323_v14 }
  0x14   : > { %s3632_s24 = scalar_lea.vmem %s4756_s2, %s3626_s14  ;;  %s3644_s27 = scalar_lea.vmem %s4754_s0, %s3626_s14  ;;  %3328 = vmatprep.subr.bf16.mxu0 %v3662_v17 }
  0x15   : > { %v539_v2 = vld [vmem:[%s3632_s24 + $0x10] sm:$0xff]  ;;  %v537_v3 = vld [vmem:[%s3632_s24] sm:$0xff]  ;;  %v540_v4 = vld [vmem:[%s3632_s24 + $0x18] sm:$0xff]  ;;  %s3696_s25 = scalar_lea.vmem %s4755_s1, %s3626_s14  ;;  %s4713_s19 = scalar_lea.vmem %s4769_s15, %s3626_s14 }
  0x16   : > { %597 = vperm.xlu1 %3464, %v539_v2   ;;  %587 = vperm.xlu0 %3463, %v537_v3   ;;  %v538_v5 = vld [vmem:[%s3632_s24 + $0x8] sm:$0xff]  ;;  %v541_v7 = vld [vmem:[%s3632_s24 + $0x20] sm:$0xff]  ;;  %v544_v11 = vld [vmem:[%s3632_s24 + $0x38] sm:$0xff] }
  0x17   : > { %v542_v6 = vld [vmem:[%s3632_s24 + $0x28] sm:$0xff]  ;;  %v549_v10 = vld [vmem:[%s3644_s27] sm:$0xff]  ;;  %v543_v12 = vld [vmem:[%s3632_s24 + $0x30] sm:$0xff] }
  0x18   : > { %v550_v13 = vld [vmem:[%s3644_s27 + $0x8] sm:$0xff]  ;;  %v551_v18 = vld [vmem:[%s3644_s27 + $0x10] sm:$0xff]  ;;  %v561_v19 = vmul.f32 %v549_v10, %v537_v3  ;;  %v545_v22 = vld [vmem:[%s3632_s24 + $0x40] sm:$0xff] }
  0x19   : > { %v562_v20 = vmul.f32 %v550_v13, %v538_v5  ;;  %v546_v21 = vld [vmem:[%s3632_s24 + $0x48] sm:$0xff]  ;;  %v552_v23 = vld [vmem:[%s3644_s27 + $0x18] sm:$0xff]  ;;  %v563_v24 = vmul.f32 %v551_v18, %v539_v2  ;;  %v547_v29 = vld [vmem:[%s3632_s24 + $0x50] sm:$0xff] }
  0x1a   : > { %602 = vperm.xlu1 %3464, %v540_v4   ;;  %592 = vperm.xlu0 %3463, %v538_v5   ;;  %v564_v25 = vmul.f32 %v552_v23, %v540_v4  ;;  %v554_v27 = vld [vmem:[%s3644_s27 + $0x28] sm:$0xff]  ;;  %v548_v28 = vld [vmem:[%s3632_s24 + $0x58] sm:$0xff]  ;;  %v671_v30 = vrot.slane %v561_v19, 7  ;;  %v553_v31 = vld [vmem:[%s3644_s27 + $0x20] sm:$0xff] }
  0x1b   : > { %v672_v26 = vrot.slane %v562_v20, 7  ;;  %v674_v32 = vrot.slane %v563_v24, 7  ;;  %v566_v33 = vmul.f32 %v554_v27, %v542_v6  ;;  %v565_v35 = vmul.f32 %v553_v31, %v541_v7  ;;  %v556_v36 = vld [vmem:[%s3644_s27 + $0x38] sm:$0xff]  ;;  %v555_v39 = vld [vmem:[%s3644_s27 + $0x30] sm:$0xff]  ;;  %v558_v44 = vld [vmem:[%s3644_s27 + $0x48] sm:$0xff] }
  0x1c   : > { %v676_v34 = vrot.slane %v564_v25, 7  ;;  %v696_v37 = vsel %vm670_vm0, 0.0, %v671_v30  ;;  %v568_v41 = vmul.f32 %v556_v36, %v544_v11  ;;  %v567_v43 = vmul.f32 %v555_v39, %v543_v12  ;;  %v557_v47 = vld [vmem:[%s3644_s27 + $0x40] sm:$0xff]  ;;  %v560_v52 = vld [vmem:[%s3644_s27 + $0x58] sm:$0xff]  ;;  %v559_v55 = vld [vmem:[%s3644_s27 + $0x50] sm:$0xff] }
  0x1d   : > { %v673_v38 = vsel %vm670_vm0, %v671_v30, %v672_v26  ;;  %v680_v40 = vrot.slane %v566_v33, 7  ;;  %v678_v42 = vrot.slane %v565_v35, 7  ;;  %v675_v45 = vsel %vm670_vm0, %v672_v26, %v674_v32  ;;  %v575_v5 = vld [vmem:[%s3696_s25 + $0x10] sm:$0xff]  ;;  %v578_v23 = vld [vmem:[%s3696_s25 + $0x28] sm:$0xff]  ;;  %v577_v24 = vld [vmem:[%s3696_s25 + $0x20] sm:$0xff] }
  0x1e   : > { %612 = vperm.xlu1 %3464, %v542_v6   ;;  %607 = vperm.xlu0 %3463, %v541_v7   ;;  %v677_v46 = vsel %vm670_vm0, %v674_v32, %v676_v34  ;;  %v684_v48 = vrot.slane %v568_v41, 7  ;;  %v570_v49 = vmul.f32 %v558_v44, %v546_v21  ;;  %v682_v50 = vrot.slane %v567_v43, 7  ;;  %v573_v6 = vld [vmem:[%s3696_s25] sm:$0xff]  ;;  %v579_v35 = vld [vmem:[%s3696_s25 + $0x30] sm:$0xff]  ;;  %v582_v44 = vld [vmem:[%s3696_s25 + $0x48] sm:$0xff] }
  0x1f   : > { %v569_v51 = vmul.f32 %v557_v47, %v545_v22  ;;  %v679_v53 = vsel %vm670_vm0, %v676_v34, %v678_v42  ;;  %v681_v54 = vsel %vm670_vm0, %v678_v42, %v680_v40  ;;  %v572_v57 = vmul.f32 %v560_v52, %v548_v28  ;;  %v580_v34 = vld [vmem:[%s3696_s25 + $0x38] sm:$0xff] }
  0x20   : > { %v688_v56 = vrot.slane %v570_v49, 7  ;;  %v571_v59 = vmul.f32 %v559_v55, %v547_v29  ;;  %v683_v60 = vsel %vm670_vm0, %v680_v40, %v682_v50  ;;  %v685_v61 = vsel %vm670_vm0, %v682_v50, %v684_v48 }
  0x21   : > { %v686_v58 = vrot.slane %v569_v51, 7  ;;  %v692_v62 = vrot.slane %v572_v57, 7 }
  0x22   : > { %622 = vperm.xlu1 %3464, %v544_v11   ;;  %617 = vperm.xlu0 %3463, %v543_v12   ;;  %v690_v63 = vrot.slane %v571_v59, 7  ;;  %v576_v11 = vld [vmem:[%s3696_s25 + $0x18] sm:$0xff]  ;;  %v574_v12 = vld [vmem:[%s3696_s25 + $0x8] sm:$0xff]  ;;  %v583_v59 = vld [vmem:[%s3696_s25 + $0x50] sm:$0xff] }
  0x23   : > { %v687_v0 = vsel %vm670_vm0, %v684_v48, %v686_v58  ;;  %v689_v1 = vsel %vm670_vm0, %v686_v58, %v688_v56  ;;  %v697_v4 = vsel %vm670_vm0, %v692_v62, 0.0  ;;  %v584_v58 = vld [vmem:[%s3696_s25 + $0x58] sm:$0xff] }
  0x24   : > { %v691_v2 = vsel %vm670_vm0, %v688_v56, %v690_v63  ;;  %v693_v3 = vsel %vm670_vm0, %v690_v63, %v692_v62 }
  0x26   : > { %632 = vperm.xlu1 %3464, %v546_v21   ;;  %627 = vperm.xlu0 %3463, %v545_v22   ;;  %v2967_v21 = vld [vmem:[%s4759_s5 + $0x20] sm:$0xff]  ;;  %v2968_v22 = vld [vmem:[%s4759_s5 + $0x28] sm:$0xff] }
  0x2a   : > { %642 = vperm.xlu1 %3464, %v548_v28   ;;  %637 = vperm.xlu0 %3463, %v547_v29   ;;  %v3331_v29 = vpack.c.bf16 %v2968_v22, %v2967_v21 }
  0x2e   : > { %740 = vperm.xlu0 %3463, %v696_v37   ;;  %744 = vperm.xlu1 %3464, %v673_v38  }
  0x32   : > { %748 = vperm.xlu0 %3463, %v675_v45   ;;  %752 = vperm.xlu1 %3464, %v677_v46   ;;  %v581_v45 = vld [vmem:[%s3696_s25 + $0x40] sm:$0xff] }
  0x36   : > { %756 = vperm.xlu0 %3463, %v679_v53   ;;  %760 = vperm.xlu1 %3464, %v681_v54  }
  0x3a   : > { %764 = vperm.xlu0 %3463, %v683_v60   ;;  %768 = vperm.xlu1 %3464, %v685_v61  }
  0x3e   : > { %772 = vperm.xlu0 %3463, %v687_v0   ;;  %776 = vperm.xlu1 %3464, %v689_v1  }
  0x42   : > { %780 = vperm.xlu0 %3463, %v691_v2   ;;  %784 = vperm.xlu1 %3464, %v693_v3  }
  0x46   : > { %986 = vperm.xlu0 %3463, %v697_v4  }
  0x95   : > { %v3700_v7 = vpop.permute.xlu1 %597  ;;  %v3702_v8 = vpop.permute.xlu0 %587 }
  0x96   : > { %v647_v9 = vmul.f32 %v3700_v7, %v575_v5  ;;  %v645_v10 = vmul.f32 %v3702_v8, %v573_v6 }
  0x98   : > { %v710_v13 = vrot.slane %v645_v10, 7  ;;  %v713_v16 = vrot.slane %v647_v9, 7 }
  0x99   : > { %v3708_v14 = vpop.permute.xlu1 %602  ;;  %v3710_v15 = vpop.permute.xlu0 %592 }
  0x9a   : > { %v648_v18 = vmul.f32 %v3708_v14, %v576_v11  ;;  %v646_v19 = vmul.f32 %v3710_v15, %v574_v12  ;;  %v3715_v20 = vsel %vm670_vm0, 0.0, %v710_v13 }
  0x9b   : > { %3157 = vmatprep.mubr.msk.f32.mxu0 %vm819_vm1, %v3715_v20  ;;  %v1075_v48 = vrot.slane %v3715_v20, 1 }
  0x9c   : > { %v711_v25 = vrot.slane %v646_v19, 7  ;;  %v715_v26 = vrot.slane %v648_v18, 7 }
  0x9d   : > { %v3727_v27 = vpop.permute.xlu1 %612  ;;  %v3729_v28 = vpop.permute.xlu0 %607 }
  0x9e   : > { %v650_v30 = vmul.f32 %v3727_v27, %v578_v23  ;;  %v649_v31 = vmul.f32 %v3729_v28, %v577_v24  ;;  %v3734_v32 = vsel %vm670_vm0, %v710_v13, %v711_v25  ;;  %v3737_v33 = vsel %vm670_vm0, %v711_v25, %v713_v16 }
  0x9f   : > { %3158 = vmatmul.mubr.msk.f32.vlgmr.msra.gmra.mrb[0].mxu0 %vm819_vm1, %v3734_v32  ;;  %v3753_v42 = vsel %vm670_vm0, %v713_v16, %v715_v26  ;;  %v1078_v49 = vrot.slane %v3737_v33, 1 }
  0xa0   : > { %v717_v36 = vrot.slane %v649_v31, 7  ;;  %3330 = vmatpush3.bf16.msra.mxu0 %v3662_v17  ;;  %3160 = vmatprep.mubr.msk.f32.mxu0 %vm819_vm1, %v3737_v33  ;;  %v719_v37 = vrot.slane %v650_v30, 7  ;;  %v1076_v17 = vrot.slane %v3734_v32, 1  ;;  %v1080_v60 = vrot.slane %v3753_v42, 1 }
  0xa1   : > { %v3746_v38 = vpop.permute.xlu1 %622  ;;  %v3748_v39 = vpop.permute.xlu0 %617  ;;  %3332 = vmatprep.subr.bf16.mxu0 %v3331_v29 }
  0xa2   : > { %v652_v40 = vmul.f32 %v3746_v38, %v580_v34  ;;  %v651_v41 = vmul.f32 %v3748_v39, %v579_v35  ;;  %v3756_v43 = vsel %vm670_vm0, %v715_v26, %v717_v36  ;;  %v3772_v52 = vsel %vm670_vm0, %v717_v36, %v719_v37 }
  0xa3   : > { %3161 = vmatmul.mubr.msk.f32.gmra.mrb[2].mxu0 %vm819_vm1, %v3753_v42  ;;  %v1077_v57 = vsel %vm1021_vm2, %v1075_v48, %v1076_v17  ;;  %v1082_v63 = vrot.slane %v3756_v43, 1  ;;  %v1079_v2 = vsel %vm1021_vm2, %v1076_v17, %v1078_v49  ;;  %v1084_v9 = vrot.slane %v3772_v52, 1 }
  0xa4   : > { %v723_v46 = vrot.slane %v652_v40, 7  ;;  %v721_v47 = vrot.slane %v651_v41, 7  ;;  %3163 = vmatprep.mubr.msk.f32.mxu0 %vm819_vm1, %v3756_v43  ;;  %v1081_v11 = vsel %vm1021_vm2, %v1078_v49, %v1080_v60  ;;  %v1349_v40 = vrot.slane %v3734_v32, 2 }
  0xa5   : > { %v3767_v50 = vpop.permute.xlu1 %632  ;;  %v3769_v51 = vpop.permute.xlu0 %627  ;;  %v1083_v16 = vsel %vm1021_vm2, %v1080_v60, %v1082_v63  ;;  %v1085_v19 = vsel %vm1021_vm2, %v1082_v63, %v1084_v9  ;;  %v1348_v17 = vrot.slane %v3715_v20, 2  ;;  %v1355_v32 = vrot.slane %v3756_v43, 2 }
  0xa6   : > { %4780 = vst [vmem:[#allocation3_spill] sm:$0xff] %v3767_v50  ;;  %4781 = vst [vmem:[#allocation4_spill] sm:$0xff] %v3769_v51  ;;  %v654_v53 = vmul.f32 %v3767_v50, %v582_v44  ;;  %v653_v54 = vmul.f32 %v3769_v51, %v581_v45  ;;  %v3777_v55 = vsel %vm670_vm0, %v719_v37, %v721_v47  ;;  %v1351_v44 = vrot.slane %v3737_v33, 2 }
  0xa7   : > { %v3780_v56 = vsel %vm670_vm0, %v721_v47, %v723_v46  ;;  %3164 = vmatmul.mubr.msk.f32.gmra.mrb[4].mxu0 %vm819_vm1, %v3772_v52  ;;  %3166 = vmatprep.mubr.msk.f32.mxu1 %vm819_vm1, %v3777_v55  ;;  %v1086_v13 = vrot.slane %v3777_v55, 1  ;;  %v1350_v47 = vsel %vm1295_vm3, %v1348_v17, %v1349_v40  ;;  %v1357_v49 = vrot.slane %v3772_v52, 2 }
  0xa8   : > { %v727_v61 = vrot.slane %v654_v53, 7  ;;  %v725_v62 = vrot.slane %v653_v54, 7  ;;  %3167 = vmatmul.mubr.msk.f32.vlgmr.msra.gmra.mrb[0].mxu1 %vm819_vm1, %v3780_v56  ;;  %3179 = vmatprep.mubr.msk.f32.mxu0 %vm819_vm1, %v1077_v57  ;;  %v1088_v18 = vrot.slane %v3780_v56, 1  ;;  %v1352_v48 = vsel %vm1295_vm3, %v1349_v40, %v1351_v44 }
  0xa9   : > { %v3794_v0 = vpop.permute.xlu1 %642  ;;  %v3796_v1 = vpop.permute.xlu0 %637  ;;  %v1087_v24 = vsel %vm1021_vm2, %v1084_v9, %v1086_v13  ;;  %v1359_v33 = vrot.slane %v3777_v55, 2  ;;  %v1361_v53 = vrot.slane %v3780_v56, 2  ;;  %v1358_v43 = vsel %vm1295_vm3, %v1355_v32, %v1357_v49 }
  0xaa   : > { %4782 = vst [vmem:[#allocation5_spill] sm:$0xff] %v3794_v0  ;;  %4783 = vst [vmem:[#allocation6_spill] sm:$0xff] %v3796_v1  ;;  %v656_v3 = vmul.f32 %v3794_v0, %v584_v58  ;;  %v655_v4 = vmul.f32 %v3796_v1, %v583_v59  ;;  %v3802_v5 = vsel %vm670_vm0, %v723_v46, %v725_v62  ;;  %v1353_v46 = vrot.slane %v3753_v42, 2 }
  0xab   : > { %v3805_v6 = vsel %vm670_vm0, %v725_v62, %v727_v61  ;;  %3169 = vmatprep.mubr.msk.f32.mxu1 %vm819_vm1, %v3802_v5  ;;  %3180 = vmatmul.mubr.msk.f32.vlgmr.msra.gmra.mrb[0].mxu0 %vm819_vm1, %v1079_v2  ;;  %v1090_v23 = vrot.slane %v3802_v5, 1  ;;  %v1089_v26 = vsel %vm1021_vm2, %v1086_v13, %v1088_v18  ;;  %v1363_v52 = vrot.slane %v3802_v5, 2 }
  0xac   : > { %v729_v10 = vrot.slane %v655_v4, 7  ;;  %3334 = vmatpush3.bf16.msra.mxu0 %v3331_v29  ;;  %3170 = vmatmul.mubr.msk.f32.gmra.mrb[2].mxu1 %vm819_vm1, %v3805_v6  ;;  %v731_v12 = vrot.slane %v656_v3, 7  ;;  %v1092_v25 = vrot.slane %v3805_v6, 1  ;;  %v1354_v20 = vsel %vm1295_vm3, %v1351_v44, %v1353_v46 }
  0xad   : > { %3182 = vmatprep.mubr.msk.f32.mxu0 %vm819_vm1, %v1081_v11  ;;  %v1091_v30 = vsel %vm1021_vm2, %v1088_v18, %v1090_v23  ;;  %v1356_v42 = vsel %vm1295_vm3, %v1353_v46, %v1355_v32  ;;  %v1360_v54 = vsel %vm1295_vm3, %v1357_v49, %v1359_v33  ;;  %v1365_v57 = vrot.slane %v3805_v6, 2  ;;  %v741_v3 = vpop.permute.xlu0 %740  ;;  %v745_v4 = vpop.permute.xlu1 %744 }
  0xae   : > { %v730_v21 = vsel %vm670_vm0, %v727_v61, %v729_v10  ;;  %v732_v22 = vsel %vm670_vm0, %v729_v10, %v731_v12  ;;  %v736_v31 = vsel %vm670_vm0, %v731_v12, 0.0  ;;  %v1093_v35 = vsel %vm1021_vm2, %v1090_v23, %v1092_v25  ;;  %v3883_v12 = vld [vmem:[%s4758_s4 + $0x1] ss:$0 sm:$0xff] }
  0xaf   : > { %3183 = vmatmul.mubr.msk.f32.gmra.mrb[2].mxu0 %vm819_vm1, %v1083_v16  ;;  %3172 = vmatprep.mubr.msk.f32.mxu1 %vm819_vm1, %v730_v21  ;;  %v1094_v29 = vrot.slane %v730_v21, 1  ;;  %v1096_v34 = vrot.slane %v732_v22, 1  ;;  %v1098_v36 = vrot.slane %v736_v31, 1  ;;  %v1362_v55 = vsel %vm1295_vm3, %v1359_v33, %v1361_v53  ;;  %v3888_v16 = vld [vmem:[%s4758_s4 + $0x2] ss:$0 sm:$0xff] }
  0xb0   : > { %3185 = vmatprep.mubr.msk.f32.mxu0 %vm819_vm1, %v1085_v19  ;;  %3173 = vmatmul.mubr.msk.f32.gmra.mrb[4].mxu1 %vm819_vm1, %v732_v22  ;;  %v1367_v58 = vrot.slane %v730_v21, 2  ;;  %v1364_v56 = vsel %vm1295_vm3, %v1361_v53, %v1363_v52  ;;  %v1369_v59 = vrot.slane %v732_v22, 2  ;;  %v1366_v60 = vsel %vm1295_vm3, %v1363_v52, %v1365_v57 }
  0xb1   : > { %v1095_v37 = vsel %vm1021_vm2, %v1092_v25, %v1094_v29  ;;  %v1097_v41 = vsel %vm1021_vm2, %v1094_v29, %v1096_v34  ;;  %v1099_v45 = vsel %vm1021_vm2, %v1096_v34, %v1098_v36  ;;  %v1371_v61 = vrot.slane %v736_v31, 2  ;;  %v749_v5 = vpop.permute.xlu0 %748  ;;  %v753_v6 = vpop.permute.xlu1 %752 }
  0xb2   : > { %v1368_v62 = vsel %vm1295_vm3, %v1365_v57, %v1367_v58  ;;  %v1370_v63 = vsel %vm1295_vm3, %v1367_v58, %v1369_v59  ;;  %v3891_v18 = vmul.f32 %v3883_v12, %v749_v5  ;;  %v996_v21 = vmul.f32 %v3883_v12, %v745_v4 }
  0xb3   : > { %3186 = vmatmul.mubr.msk.f32.gmra.mrb[4].mxu0 %vm819_vm1, %v1087_v24  ;;  %v1372_v2 = vsel %vm1295_vm3, %v1369_v59, %v1371_v61  ;;  %v3901_v24 = vld [vmem:[%s4758_s4] ss:$0 sm:$0xff]  ;;  %v995_v25 = vmul.f32 %v3883_v12, %v741_v3  ;;  %v1270_v29 = vmul.f32 %v3888_v16, %v745_v4  ;;  %v3908_v31 = vmul.f32 %v3888_v16, %v749_v5 }
  0xb4   : > { %3188 = vmatprep.mubr.msk.f32.mxu0 %vm819_vm1, %v1089_v26  ;;  %v1269_v26 = vmul.f32 %v3888_v16, %v741_v3  ;;  %v1023_v36 = vrot.slane %v996_v21, 1  ;;  %v794_v17 = vmul.f32 %v3901_v24, %v745_v4  ;;  %v3914_v44 = vmul.f32 %v3888_v16, %v753_v6 }
  0xb5   : > { %v757_v9 = vpop.permute.xlu0 %756  ;;  %v761_v13 = vpop.permute.xlu1 %760  ;;  %v1022_v40 = vrot.slane %v995_v25, 1  ;;  %v1297_v46 = vrot.slane %v1270_v29, 2  ;;  %v795_v33 = vmul.f32 %v3901_v24, %v749_v5  ;;  %v796_v52 = vmul.f32 %v3901_v24, %v753_v6 }
  0xb6   : > { %v3922_v32 = vmul.f32 %v3888_v16, %v757_v9  ;;  %v3932_v53 = vmul.f32 %v3883_v12, %v761_v13  ;;  %v1301_v58 = vrot.slane %v3914_v44, 2 }
  0xb7   : > { %3189 = vmatmul.mubr.msk.f32.gmra.mrb[6].mxu0 %vm819_vm1, %v1091_v30  ;;  %v1025_v30 = vrot.slane %v3891_v18, 1 }
  0xb8   : > { %3191 = vmatprep.mubr.msk.f32.mxu0 %vm819_vm1, %v1093_v35  ;;  %v793_v35 = vmul.f32 %v3901_v24, %v741_v3  ;;  %v1031_v4 = vrot.slane %v3932_v53, 1 }
  0xb9   : > { %v765_v22 = vpop.permute.xlu0 %764  ;;  %v769_v34 = vpop.permute.xlu1 %768 }
  0xba   : > { %v1001_v57 = vmul.f32 %v3883_v12, %v765_v22  ;;  %v3945_v59 = vmul.f32 %v3888_v16, %v765_v22  ;;  %v3951_v3 = vmul.f32 %v3888_v16, %v769_v34 }
  0xbb   : > { %3192 = vmatmul.mubr.msk.f32.gmra.mrb[8].mxu0 %vm819_vm1, %v1095_v37  ;;  %v998_v37 = vmul.f32 %v3883_v12, %v753_v6 }
  0xbc   : > { %3194 = vmatprep.mubr.msk.f32.mxu0 %vm819_vm1, %v1097_v41  ;;  %v1296_v41 = vrot.slane %v1269_v26, 2  ;;  %v1033_v21 = vrot.slane %v1001_v57, 1 }
  0xbe   : > { %v1034_v5 = vsel %vm1021_vm2, %v1031_v4, %v1033_v21 }
  0xbf   : > { %3195 = vmatmul.mubr.msk.f32.gmra.mrb[10].mxu0 %vm819_vm1, %v1099_v45 }
  0xc0   : > { %3201 = vmatprep.mubr.msk.f32.mxu0 %vm819_vm1, %v1350_v47  ;;  %v3919_v47 = vmul.f32 %v3883_v12, %v757_v9 }
  0xc3   : > { %3202 = vmatmul.mubr.msk.f32.vlgmr.msra.gmra.mrb[0].mxu0 %vm819_vm1, %v1352_v48  ;;  %v773_v48 = vpop.permute.xlu0 %772 }
  0xc4   : > { %3204 = vmatprep.mubr.msk.f32.mxu0 %vm819_vm1, %v1354_v20  ;;  %v1026_v20 = vsel %vm1021_vm2, %v1023_v36, %v1025_v30  ;;  %v1003_v26 = vmul.f32 %v3883_v12, %v773_v48 }
  0xc5   : > { %v3369_v61 = vadd.f32 %v1026_v20, %v794_v17  ;;  %v799_v17 = vmul.f32 %v3901_v24, %v765_v22  ;;  %v1298_v20 = vsel %vm1295_vm3, %v1296_v41, %v1297_v46 }
  0xc7   : > { %3205 = vmatmul.mubr.msk.f32.gmra.mrb[2].mxu0 %vm819_vm1, %v1356_v42  ;;  %v1299_v42 = vrot.slane %v3908_v31, 2  ;;  %v781_v31 = vpop.permute.xlu0 %780 }
  0xc8   : > { %3207 = vmatprep.mubr.msk.f32.mxu0 %vm819_vm1, %v1358_v43  ;;  %v3935_v43 = vmul.f32 %v3888_v16, %v761_v13 }
  0xc9   : > { %v1300_v6 = vsel %vm1295_vm3, %v1297_v46, %v1299_v42  ;;  %v3980_v46 = vmul.f32 %v3888_v16, %v781_v31  ;;  %v1302_v18 = vsel %vm1295_vm3, %v1299_v42, %v1301_v58 }
  0xca   : > { %v3370_v44 = vadd.f32 %v3369_v61, %v1300_v6  ;;  %v1037_v61 = vrot.slane %v1003_v26, 1 }
  0xcb   : > { %3208 = vmatmul.mubr.msk.f32.gmra.mrb[4].mxu0 %vm819_vm1, %v1360_v54  ;;  %v1027_v54 = vrot.slane %v998_v37, 1  ;;  %v800_v37 = vmul.f32 %v3901_v24, %v769_v34  ;;  %v1315_v51 = vrot.slane %v3980_v46, 2 }
  0xcc   : > { %3210 = vmatprep.mubr.msk.f32.mxu0 %vm819_vm1, %v1362_v55  ;;  %v1002_v55 = vmul.f32 %v3883_v12, %v769_v34 }
  0xce   : > { %v1035_v25 = vrot.slane %v1002_v55, 1  ;;  %v3972_v55 = vmul.f32 %v3883_v12, %v781_v31 }
  0xcf   : > { %3211 = vmatmul.mubr.msk.f32.gmra.mrb[6].mxu0 %vm819_vm1, %v1364_v56  ;;  %v3942_v56 = vmul.f32 %v3901_v24, %v757_v9  ;;  %v1024_v9 = vsel %vm1021_vm2, %v1022_v40, %v1023_v36  ;;  %v3966_v40 = vmul.f32 %v3888_v16, %v773_v48 }
  0xd0   : > { %3213 = vmatprep.mubr.msk.f32.mxu0 %vm819_vm1, %v1366_v60  ;;  %v777_v60 = vpop.permute.xlu1 %776  ;;  %v3372_v53 = vadd.f32 %v1024_v9, %v793_v35  ;;  %v1036_v35 = vsel %vm1021_vm2, %v1033_v21, %v1035_v25  ;;  %v801_v9 = vmul.f32 %v3901_v24, %v773_v48  ;;  %v4779_v48 = vrot.slane %v3972_v55, 1 }
  0xd1   : > { %v1004_v29 = vmul.f32 %v3883_v12, %v777_v60  ;;  %v3969_v57 = vmul.f32 %v3888_v16, %v777_v60  ;;  %v802_v41 = vmul.f32 %v3901_v24, %v777_v60  ;;  %v1311_v0 = vrot.slane %v3966_v40, 2 }
  0xd3   : > { %3214 = vmatmul.mubr.msk.f32.gmra.mrb[8].mxu0 %vm819_vm1, %v1368_v62  ;;  %v1029_v62 = vrot.slane %v3919_v47, 1  ;;  %v1039_v6 = vrot.slane %v1004_v29, 1  ;;  %v1028_v47 = vsel %vm1021_vm2, %v1025_v30, %v1027_v54  ;;  %v987_v29 = vpop.permute.xlu0 %986  ;;  %v1038_v30 = vsel %vm1021_vm2, %v1035_v25, %v1037_v61 }
  0xd4   : > { %3216 = vmatprep.mubr.msk.f32.mxu0 %vm819_vm1, %v1370_v63  ;;  %v4770_v63 = vrot.slane %v3922_v32, 2  ;;  %v785_v34 = vpop.permute.xlu1 %784  ;;  %v3378_v21 = vadd.f32 %v1028_v47, %v795_v33  ;;  %v4008_v42 = vmul.f32 %v3888_v16, %v987_v29  ;;  %v4013_v33 = vld [vmem:[%s4760_s6] ss:$0 sm:$0xff]  ;;  %v4784_v25 = vrot.slane %v3945_v59, 2 }
  0xd5   : > { %v1030_v36 = vsel %vm1021_vm2, %v1027_v54, %v1029_v62  ;;  %v3991_v26 = vmul.f32 %v3888_v16, %v785_v34  ;;  %v3999_v54 = vsel %vm1021_vm2, %v1037_v61, %v1039_v6  ;;  %v1032_v47 = vsel %vm1021_vm2, %v1029_v62, %v1031_v4 }
  0xd6   : > { %v1304_v22 = vsel %vm1295_vm3, %v1301_v58, %v4770_v63  ;;  %v3373_v63 = vadd.f32 %v3372_v53, %v1298_v20  ;;  %v3375_v60 = vadd.f32 %v1030_v36, %v796_v52  ;;  %v1007_v20 = vmul.f32 %v3883_v12, %v987_v29 }
  0xd7   : > { %3217 = vmatmul.mubr.msk.f32.gmra.mrb[10].mxu0 %vm819_vm1, %v1372_v2  ;;  %v798_v2 = vmul.f32 %v3901_v24, %v761_v13  ;;  %v3988_v13 = vmul.f32 %v3883_v12, %v785_v34  ;;  %v804_v52 = vmul.f32 %v3901_v24, %v785_v34  ;;  %v803_v53 = vmul.f32 %v3901_v24, %v781_v31 }
  0xd8   : > { %v1042_v12 = vsel %vm1021_vm2, %v1039_v6, %v4779_v48  ;;  %v4785_v31 = vrot.slane %v3935_v43, 2  ;;  %v3379_v29 = vadd.f32 %v3378_v21, %v1302_v18  ;;  %v4790_v18 = vrot.slane %v3945_v59, 2 }
  0xd9   : > { %v3381_v50 = vadd.f32 %v1034_v5, %v798_v2  ;;  %v1043_v36 = vrot.slane %v3988_v13, 1  ;;  %v3376_v2 = vadd.f32 %v3375_v60, %v1304_v22  ;;  %v1045_v22 = vrot.slane %v1007_v20, 1 }
  0xda   : > { %v1308_v16 = vsel %vm1295_vm3, %v4785_v31, %v4784_v25  ;;  %v1319_v25 = vrot.slane %v4008_v42, 2  ;;  %v4791_v20 = vrot.slane %v3969_v57, 2 }
  0xdb   : > { %v3382_v1 = vadd.f32 %v3381_v50, %v1308_v16  ;;  %v4037_v50 = vld [vmem:[%s4757_s3] ss:$0 sm:$0xff] }
 0x17b   : > { %v3876_v10 = vpop.f32.mrb[0].mxu1 }
 0x17c   : > { %v3878_v11 = vpop.f32.mrb[1].mxu1  ;;  %v977_v34 = vadd.f32 %v3876_v10, %v800_v37  ;;  %v3384_v10 = vadd.f32 %v1032_v47, %v3942_v56  ;;  %v1316_v56 = vsel %vm1295_vm3, %v4791_v20, %v1315_v51 }
 0x17d   : > { %v976_v60 = vadd.f32 %v3878_v11, %v799_v17  ;;  %v4788_v11 = vrot.slane %v3951_v3, 2 }
 0x17f   : > { %v3893_v19 = vpop.f32.mrb[2].mxu1  ;;  %v4789_v17 = vmov %v4788_v11  ;;  %v1065_v16 = vadd.f32 %v1036_v35, %v976_v60  ;;  %v1046_v35 = vsel %vm1021_vm2, %v1043_v36, %v1045_v22 }
 0x180   : > { %v3896_v23 = vpop.f32.mrb[3].mxu1  ;;  %v1310_v21 = vsel %vm1295_vm3, %v4790_v18, %v4789_v17 }
 0x181   : > { %v978_v59 = vadd.f32 %v3896_v23, %v801_v9 }
 0x183   : > { %v3916_v45 = vpop.f32.mrb[4].mxu1 }
 0x184   : > { %v3924_v49 = vpop.f32.mrb[5].mxu1  ;;  %v981_v22 = vadd.f32 %v3916_v45, %v804_v52 }
 0x196   : > { %v3203_v58 = vpop.f32.mrb[0].mxu0 }
 0x197   : > { %v3371_v5 = vadd.f32 %v3370_v44, %v3203_v58  ;;  %v1463_v24 = vpop.f32.mrb[1].mxu0  ;;  %v4786_v44 = vmov %v4785_v31  ;;  %v4787_v58 = vrot.slane %v3922_v32, 2  ;;  %v1312_v32 = vsel %vm1295_vm3, %v4788_v11, %v1311_v0 }
 0x198   : > { %v3374_v61 = vadd.f32 %v3373_v63, %v1463_v24  ;;  %v980_v11 = vadd.f32 %v3924_v49, %v803_v53  ;;  %v1070_v53 = vadd.f32 %v1046_v35, %v981_v22 }
 0x199   : > { %v1542_v6 = vadd.f32 %v3371_v5, %v4013_v33  ;;  %v1306_v48 = vsel %vm1295_vm3, %v4787_v58, %v4786_v44  ;;  %v1066_v5 = vadd.f32 %v1038_v30, %v977_v34 }
 0x19a   : > { %v1541_v62 = vadd.f32 %v3374_v61, %v4013_v33  ;;  %v3206_v4 = vpop.f32.mrb[2].mxu0  ;;  %v3385_v44 = vadd.f32 %v3384_v10, %v1306_v48  ;;  %v1067_v10 = vadd.f32 %v3999_v54, %v978_v59 }
 0x19b   : > { %v1554_v43 = vmax.f32 %v1542_v6, 0.0  ;;  %v3377_v63 = vadd.f32 %v3376_v2, %v3206_v4  ;;  %v1473_v37 = vpop.f32.mrb[3].mxu0  ;;  %v979_v2 = vadd.f32 %v3893_v19, %v802_v41  ;;  %v3393_v4 = vadd.f32 %v1310_v21, %v1065_v16 }
 0x19c   : > { %v1553_v24 = vmax.f32 %v1541_v62, 0.0  ;;  %v3380_v31 = vadd.f32 %v3379_v29, %v1473_v37  ;;  %v3389_v62 = vadd.f32 %v1312_v32, %v1066_v5 }
 0x19d   : > { %v1544_v47 = vadd.f32 %v3377_v63, %v4013_v33  ;;  %v4058_v3 = vadd.f32 %v4037_v50, %v1554_v43  ;;  %v1068_v60 = vadd.f32 %v1042_v12, %v979_v2 }
 0x19e   : > { %v1543_v61 = vadd.f32 %v3380_v31, %v4013_v33  ;;  %v3209_v6 = vpop.f32.mrb[4].mxu0  ;;  %v4063_v58 = vadd.f32 %v4037_v50, %v1553_v24  ;;  %v4793_v24 = vrot.slane %v3969_v57, 2 }
 0x19f   : > { %v1556_v30 = vmax.f32 %v1544_v47, 0.0  ;;  %v1483_v19 = vpop.f32.mrb[5].mxu0  ;;  %v1587_v41 = vsel %vm1583_vm4, %v4058_v3, 0.0  ;;  %v1633_v34 = vmul.f32 %v4058_v3, %v4058_v3  ;;  %v3383_v17 = vadd.f32 %v3382_v1, %v3209_v6 }
 0x1a0   : > { %v1555_v23 = vmax.f32 %v1543_v61, 0.0  ;;  %v3386_v9 = vadd.f32 %v3385_v44, %v1483_v19  ;;  %1588 = vadd.xlane.f32.xlu0 %v1587_v41  ;;  %v1584_v48 = vsel %vm1583_vm4, %v4063_v58, 0.0  ;;  %v1632_v29 = vmul.f32 %v4063_v58, %v4063_v58 }
 0x1a1   : > { %1585 = vadd.xlane.f32.xlu1 %v1584_v48  ;;  %v1647_v12 = vsel %vm1583_vm4, %v1633_v34, 0.0  ;;  %v4085_v45 = vadd.f32 %v4037_v50, %v1556_v30  ;;  %v4792_v1 = vrot.slane %v3972_v55, 1  ;;  %v3397_v5 = vadd.f32 %v1316_v56, %v1068_v60 }
 0x1a2   : > { %v4080_v43 = vadd.f32 %v4037_v50, %v1555_v23  ;;  %v1545_v63 = vadd.f32 %v3386_v9, %v4013_v33  ;;  %v3212_v37 = vpop.f32.mrb[6].mxu0  ;;  %v1644_v54 = vsel %vm1583_vm4, %v1632_v29, 0.0  ;;  %v1314_v31 = vsel %vm1295_vm3, %v1311_v0, %v4793_v24 }
 0x1a3   : > { %v3390_v18 = vadd.f32 %v3389_v62, %v3212_v37  ;;  %v1493_v20 = vpop.f32.mrb[7].mxu0  ;;  %v1044_v21 = vsel %vm1021_vm2, %v4792_v1, %v1043_v36  ;;  %v3401_v47 = vadd.f32 %v1314_v31, %v1067_v10  ;;  %v1546_v59 = vadd.f32 %v3383_v17, %v4013_v33 }
 0x1a4   : > { %v1557_v52 = vmax.f32 %v1545_v63, 0.0  ;;  %v3394_v32 = vadd.f32 %v3393_v4, %v1493_v20  ;;  %1648 = vadd.xlane.f32.xlu0 %v1647_v12  ;;  %v1634_v49 = vmul.f32 %v4080_v43, %v4080_v43  ;;  %v1069_v16 = vadd.f32 %v1044_v21, %v980_v11 }
 0x1a5   : > { %1645 = vadd.xlane.f32.xlu1 %v1644_v54  ;;  %v1593_v13 = vsel %vm1583_vm4, %v4085_v45, 0.0  ;;  %v4794_v55 = vrot.slane %v3991_v26, 2  ;;  %v1590_v23 = vsel %vm1583_vm4, %v4080_v43, 0.0  ;;  %v1635_v9 = vmul.f32 %v4085_v45, %v4085_v45 }
 0x1a6   : > { %v3215_v2 = vpop.f32.mrb[8].mxu0  ;;  %v1547_v40 = vadd.f32 %v3394_v32, %v4013_v33  ;;  %v1650_v0 = vsel %vm1583_vm4, %v1634_v49, 0.0  ;;  %v4111_v56 = vadd.f32 %v4037_v50, %v1557_v52  ;;  %v1548_v46 = vadd.f32 %v3390_v18, %v4013_v33 }
 0x1a7   : > { %v3398_v61 = vadd.f32 %v3397_v5, %v3215_v2  ;;  %v1503_v6 = vpop.f32.mrb[9].mxu0  ;;  %v1320_v57 = vsel %vm1295_vm3, %v4794_v55, %v1319_v25  ;;  %v4795_v35 = vmov %v4794_v55  ;;  %v1558_v25 = vmax.f32 %v1546_v59, 0.0 }
 0x1a8   : > { %v3402_v36 = vadd.f32 %v3401_v47, %v1503_v6  ;;  %1594 = vadd.xlane.f32.xlu0 %v1593_v13  ;;  %v3405_v44 = vadd.f32 %v1320_v57, %v1070_v53  ;;  %v1318_v42 = vsel %vm1295_vm3, %v1315_v51, %v4795_v35  ;;  %v1559_v48 = vmax.f32 %v1547_v40, 0.0 }
 0x1a9   : > { %1651 = vadd.xlane.f32.xlu1 %v1650_v0  ;;  %v3409_v19 = vadd.f32 %v1318_v42, %v1069_v16  ;;  %v1596_v26 = vsel %vm1583_vm4, %v4111_v56, 0.0  ;;  %v1636_v51 = vmul.f32 %v4111_v56, %v4111_v56  ;;  %v1653_v60 = vsel %vm1583_vm4, %v1635_v9, 0.0 }
 0x1aa   : > { %v3218_v30 = vpop.f32.mrb[10].mxu0  ;;  %v4129_v22 = vadd.f32 %v4037_v50, %v1558_v25  ;;  %v1549_v62 = vadd.f32 %v3402_v36, %v4013_v33  ;;  %v4134_v10 = vadd.f32 %v4037_v50, %v1559_v48  ;;  %v1560_v11 = vmax.f32 %v1548_v46, 0.0  ;;  %v2986_v25 = vld [vmem:[%s4763_s9 + $0x28] sm:$0xff]  ;;  %v1853_v48 = vld [vmem:[%s4763_s9] sm:$0xff] }
 0x1ab   : > { %v3406_v41 = vadd.f32 %v3405_v44, %v3218_v30  ;;  %v1513_v34 = vpop.f32.mrb[11].mxu0  ;;  %v1656_v4 = vsel %vm1583_vm4, %v1636_v51, 0.0  ;;  %v1550_v12 = vadd.f32 %v3398_v61, %v4013_v33 }
 0x1ac   : > { %v3410_v29 = vadd.f32 %v3409_v19, %v1513_v34  ;;  %1591 = vadd.xlane.f32.xlu0 %v1590_v23  ;;  %v1599_v63 = vsel %vm1583_vm4, %v4129_v22, 0.0  ;;  %v1637_v37 = vmul.f32 %v4129_v22, %v4129_v22  ;;  %v1561_v17 = vmax.f32 %v1549_v62, 0.0  ;;  %v2985_v19 = vld [vmem:[%s4763_s9 + $0x20] sm:$0xff]  ;;  %v2987_v34 = vld [vmem:[%s4763_s9 + $0x30] sm:$0xff]  ;;  %v2988_v23 = vld [vmem:[%s4763_s9 + $0x38] sm:$0xff] }
 0x1ad   : > { %1597 = vadd.xlane.f32.xlu1 %v1596_v26  ;;  %v1602_v18 = vsel %vm1583_vm4, %v4134_v10, 0.0  ;;  %v1638_v20 = vmul.f32 %v4134_v10, %v4134_v10  ;;  %v4147_v32 = vadd.f32 %v4037_v50, %v1560_v11  ;;  %v1562_v1 = vmax.f32 %v1550_v12, 0.0 }
 0x1ae   : > { %v1659_v52 = vsel %vm1583_vm4, %v1637_v37, 0.0  ;;  %v1551_v54 = vadd.f32 %v3410_v29, %v4013_v33  ;;  %v4152_v53 = vadd.f32 %v4037_v50, %v1561_v17  ;;  %v1552_v24 = vadd.f32 %v3406_v41, %v4013_v33  ;;  %v1854_v29 = vld [vmem:[%s4763_s9 + $0x8] sm:$0xff] }
 0x1af   : > { %v1662_v49 = vsel %vm1583_vm4, %v1638_v20, 0.0  ;;  %v1605_v21 = vsel %vm1583_vm4, %v4147_v32, 0.0  ;;  %v1639_v5 = vmul.f32 %v4147_v32, %v4147_v32  ;;  %v4165_v59 = vadd.f32 %v4037_v50, %v1562_v1 }
 0x1b0   : > { %1654 = vadd.xlane.f32.xlu0 %v1653_v60  ;;  %v1563_v31 = vmax.f32 %v1551_v54, 0.0  ;;  %v1608_v16 = vsel %vm1583_vm4, %v4152_v53, 0.0  ;;  %v1640_v2 = vmul.f32 %v4152_v53, %v4152_v53  ;;  %v1564_v61 = vmax.f32 %v1552_v24, 0.0 }
 0x1b1   : > { %1657 = vadd.xlane.f32.xlu1 %v1656_v4  ;;  %v1665_v47 = vsel %vm1583_vm4, %v1639_v5, 0.0  ;;  %v1611_v13 = vsel %vm1583_vm4, %v4165_v59, 0.0  ;;  %v1641_v55 = vmul.f32 %v4165_v59, %v4165_v59  ;;  %v3335_v41 = vpack.c.bf16 %v2986_v25, %v2985_v19 }
 0x1b2   : > { %v1668_v6 = vsel %vm1583_vm4, %v1640_v2, 0.0  ;;  %v4169_v33 = vadd.f32 %v4037_v50, %v1563_v31  ;;  %v4180_v36 = vadd.f32 %v4037_v50, %v1564_v61  ;;  %v3339_v9 = vpack.c.bf16 %v2988_v23, %v2987_v34  ;;  %v4223_v34 = vld [vmem:[%s4761_s7] ss:$0 sm:$0xff] }
 0x1b3   : > { %v1671_v0 = vsel %vm1583_vm4, %v1641_v55, 0.0  ;;  %3336 = vmatprep.subr.bf16.mxu1 %v3335_v41  ;;  %v4207_v26 = vpack.c.bf16 %v1854_v29, %v1853_v48 }
 0x1b4   : > { %1600 = vadd.xlane.f32.xlu0 %v1599_v63  ;;  %v1614_v57 = vsel %vm1583_vm4, %v4169_v33, 0.0  ;;  %v1642_v40 = vmul.f32 %v4169_v33, %v4169_v33  ;;  %v1643_v35 = vmul.f32 %v4180_v36, %v4180_v36  ;;  %v1617_v42 = vsel %vm1583_vm4, %v4180_v36, 0.0  ;;  %3338 = vmatpush3.bf16.msra.mxu1 %v3335_v41 }
 0x1b5   : > { %1603 = vadd.xlane.f32.xlu1 %v1602_v18  ;;  %3340 = vmatprep.subr.bf16.mxu1 %v3339_v9 }
 0x1b6   : > { %v1674_v44 = vsel %vm1583_vm4, %v1642_v40, 0.0  ;;  %v1677_v30 = vsel %vm1583_vm4, %v1643_v35, 0.0 }
 0x1b8   : > { %1660 = vadd.xlane.f32.xlu0 %v1659_v52  ;;  %3342 = vmatpush3.bf16.msra.mxu1 %v3339_v9 }
 0x1b9   : > { %1663 = vadd.xlane.f32.xlu1 %v1662_v49  ;;  %3344 = vmatprep.subr.bf16.mxu1 %v4207_v26 }
 0x1bc   : > { %1606 = vadd.xlane.f32.xlu0 %v1605_v21 }
 0x1bd   : > { %1609 = vadd.xlane.f32.xlu1 %v1608_v16 }
 0x1c0   : > { %1666 = vadd.xlane.f32.xlu0 %v1665_v47 }
 0x1c1   : > { %1669 = vadd.xlane.f32.xlu1 %v1668_v6 }
 0x1c4   : > { %1612 = vadd.xlane.f32.xlu0 %v1611_v13 }
 0x1c5   : > { %1615 = vadd.xlane.f32.xlu1 %v1614_v57 }
 0x1c8   : > { %1672 = vadd.xlane.f32.xlu0 %v1671_v0 }
 0x1c9   : > { %1675 = vadd.xlane.f32.xlu1 %v1674_v44 }
 0x1cc   : > { %1618 = vadd.xlane.f32.xlu0 %v1617_v42 }
 0x1cd   : > { %1678 = vadd.xlane.f32.xlu1 %v1677_v30 }
 0x22d   : > { %v1589_v51 = vpop.xlane.xlu0 %1588 }
 0x22e   : > { %v1621_v46 = vmul.f32 0.03125, %v1589_v51  ;;  %v1586_v60 = vpop.xlane.xlu1 %1585 }
 0x22f   : > { %v1620_v62 = vmul.f32 0.03125, %v1586_v60 }
 0x230   : > { %v1693_v11 = vmul.f32 %v1621_v46, %v1621_v46  ;;  %v1717_v42 = vsub.f32 %v4058_v3, %v1621_v46 }
 0x231   : > { %v1649_v4 = vpop.xlane.xlu0 %1648  ;;  %v1692_v17 = vmul.f32 %v1620_v62, %v1620_v62  ;;  %v1716_v41 = vsub.f32 %v4063_v58, %v1620_v62  ;;  %v4232_v58 = vld [vmem:[%s4762_s8] ss:$0 sm:$0xff] }
 0x232   : > { %v1681_v63 = vmul.f32 0.03125, %v1649_v4  ;;  %v1646_v37 = vpop.xlane.xlu1 %1645 }
 0x233   : > { %v1680_v18 = vmul.f32 0.03125, %v1646_v37 }
 0x234   : > { %v1705_v20 = vsub.f32 %v1681_v63, %v1693_v11 }
 0x235   : > { %v1704_v12 = vsub.f32 %v1680_v18, %v1692_v17  ;;  %v1595_v52 = vpop.xlane.xlu0 %1594 }
 0x236   : > { %v1729_v54 = vadd.f32 0.0001, %v1705_v20  ;;  %v1652_v49 = vpop.xlane.xlu1 %1651  ;;  %v4210_v5 = vmul.f32 0.03125, %v1595_v52 }
 0x237   : > { %v1728_v1 = vadd.f32 0.0001, %v1704_v12  ;;  %v1682_v2 = vmul.f32 0.03125, %v1652_v49 }
 0x238   : > { %3465 = vrsqrt.f32 %v1729_v54  ;;  %v1695_v6 = vmul.f32 %v4210_v5, %v4210_v5 }
 0x239   : > { %3467 = vrsqrt.f32 %v1728_v1  ;;  %v1592_v21 = vpop.xlane.xlu0 %1591 }
 0x23a   : > { %v1622_v24 = vmul.f32 0.03125, %v1592_v21  ;;  %v1598_v31 = vpop.xlane.xlu1 %1597 }
 0x23b   : > { %v4212_v16 = vmul.f32 0.03125, %v1598_v31 }
 0x23c   : > { %v1694_v47 = vmul.f32 %v1622_v24, %v1622_v24 }
 0x23d   : > { %v1655_v61 = vpop.xlane.xlu0 %1654  ;;  %v1696_v40 = vmul.f32 %v4212_v16, %v4212_v16 }
 0x23e   : > { %v1706_v13 = vsub.f32 %v1682_v2, %v1694_v47  ;;  %v1683_v55 = vmul.f32 0.03125, %v1655_v61  ;;  %v1658_v57 = vpop.xlane.xlu1 %1657 }
 0x23f   : > { %v1684_v0 = vmul.f32 0.03125, %v1658_v57 }
 0x240   : > { %v1730_v44 = vadd.f32 0.0001, %v1706_v13  ;;  %v1707_v35 = vsub.f32 %v1683_v55, %v1695_v6  ;;  %v1718_v6 = vsub.f32 %v4080_v43, %v1622_v24 }
 0x241   : > { %v1708_v30 = vsub.f32 %v1684_v0, %v1696_v40  ;;  %v1601_v19 = vpop.xlane.xlu0 %1600  ;;  %v1719_v0 = vsub.f32 %v4085_v45, %v4210_v5 }
 0x242   : > { %v3466_v25 = vpop.eup %3465  ;;  %3469 = vrsqrt.f32 %v1730_v44  ;;  %v1731_v23 = vadd.f32 0.0001, %v1707_v35  ;;  %v4225_v9 = vmul.f32 0.03125, %v1601_v19  ;;  %v1604_v48 = vpop.xlane.xlu1 %1603 }
 0x243   : > { %v3468_v29 = vpop.eup %3467  ;;  %v1753_v51 = vmul.f32 %v3466_v25, %v1717_v42  ;;  %v1732_v60 = vadd.f32 0.0001, %v1708_v30  ;;  %v4227_v4 = vmul.f32 0.03125, %v1604_v48  ;;  %v1720_v42 = vsub.f32 %v4111_v56, %v4212_v16 }
 0x244   : > { %v1752_v3 = vmul.f32 %v3468_v29, %v1716_v41  ;;  %3471 = vrsqrt.f32 %v1731_v23  ;;  %v1697_v63 = vmul.f32 %v4225_v9, %v4225_v9 }
 0x245   : > { %v1772_v46 = vmul.f32 %v4223_v34, %v1753_v51  ;;  %3473 = vrsqrt.f32 %v1732_v60  ;;  %v1661_v62 = vpop.xlane.xlu0 %1660  ;;  %v1698_v18 = vmul.f32 %v4227_v4, %v4227_v4 }
 0x246   : > { %v1771_v11 = vmul.f32 %v4223_v34, %v1752_v3  ;;  %v1685_v37 = vmul.f32 0.03125, %v1661_v62  ;;  %v1664_v17 = vpop.xlane.xlu1 %1663 }
 0x247   : > { %v1686_v20 = vmul.f32 0.03125, %v1664_v17  ;;  %v1791_v12 = vadd.f32 %v4232_v58, %v1772_v46 }
 0x248   : > { %v1709_v52 = vsub.f32 %v1685_v37, %v1697_v63  ;;  %v1790_v54 = vadd.f32 %v4232_v58, %v1771_v11 }
 0x249   : > { %v1710_v49 = vsub.f32 %v1686_v20, %v1698_v18  ;;  %v1607_v1 = vpop.xlane.xlu0 %1606  ;;  %v4243_v21 = vmul.f32 %v1791_v12, %v3710_v15 }
 0x24a   : > { %v1733_v31 = vadd.f32 0.0001, %v1709_v52  ;;  %v4245_v2 = vmul.f32 0.03125, %v1607_v1  ;;  %v1610_v47 = vpop.xlane.xlu1 %1609  ;;  %v1802_v61 = vmul.f32 %v1790_v54, %v3702_v8 }
 0x24b   : > { %v1734_v13 = vadd.f32 0.0001, %v1710_v49  ;;  %v4249_v55 = vmul.f32 0.03125, %v1610_v47  ;;  %v1827_v57 = vrot.slane %v4243_v21, 7  ;;  %v1721_v47 = vsub.f32 %v4129_v22, %v4225_v9  ;;  %v1855_v22 = vld [vmem:[%s4763_s9 + $0x10] sm:$0xff] }
 0x24c   : > { %v3470_v40 = vpop.eup %3469  ;;  %3475 = vrsqrt.f32 %v1733_v31  ;;  %v1826_v44 = vrot.slane %v1802_v61, 7  ;;  %v1699_v30 = vmul.f32 %v4245_v2, %v4245_v2 }
 0x24d   : > { %v1754_v35 = vmul.f32 %v3470_v40, %v1718_v6  ;;  %3477 = vrsqrt.f32 %v1734_v13  ;;  %v1667_v43 = vpop.xlane.xlu0 %1666  ;;  %v1700_v19 = vmul.f32 %v4249_v55, %v4249_v55  ;;  %v1722_v13 = vsub.f32 %v4134_v10, %v4227_v4  ;;  %v1856_v10 = vld [vmem:[%s4763_s9 + $0x18] sm:$0xff] }
 0x24e   : > { %v3472_v24 = vpop.eup %3471  ;;  %v1687_v25 = vmul.f32 0.03125, %v1667_v43  ;;  %v1670_v41 = vpop.xlane.xlu1 %1669  ;;  %v4261_v23 = vsel %vm670_vm0, %v1826_v44, %v1827_v57  ;;  %v4264_v45 = vsel %vm670_vm0, 0.0, %v1826_v44 }
 0x24f   : > { %v3474_v5 = vpop.eup %3473  ;;  %v1773_v56 = vmul.f32 %v4223_v34, %v1754_v35  ;;  %v1755_v16 = vmul.f32 %v3472_v24, %v1719_v0  ;;  %v1688_v48 = vmul.f32 0.03125, %v1670_v41  ;;  %v1864_v29 = vrot.slane %v4264_v45, 1 }
 0x250   : > { %v1756_v51 = vmul.f32 %v3474_v5, %v1720_v42  ;;  %v1711_v60 = vsub.f32 %v1687_v25, %v1699_v30  ;;  %v1865_v3 = vrot.slane %v4261_v23, 1  ;;  %v2192_v46 = vrot.slane %v4264_v45, 2 }
 0x251   : > { %v1792_v62 = vadd.f32 %v4232_v58, %v1773_v56  ;;  %v1774_v11 = vmul.f32 %v4223_v34, %v1755_v16  ;;  %v1712_v63 = vsub.f32 %v1688_v48, %v1700_v19  ;;  %v1613_v37 = vpop.xlane.xlu0 %1612  ;;  %v2193_v17 = vrot.slane %v4261_v23, 2 }
 0x252   : > { %v1775_v18 = vmul.f32 %v4223_v34, %v1756_v51  ;;  %v1735_v20 = vadd.f32 0.0001, %v1711_v60  ;;  %v4274_v12 = vmul.f32 0.03125, %v1613_v37  ;;  %v1866_v52 = vsel %vm1021_vm2, %v1864_v29, %v1865_v3  ;;  %v1616_v54 = vpop.xlane.xlu1 %1615 }
 0x253   : > { %v1804_v49 = vmul.f32 %v1792_v62, %v3700_v7  ;;  %v1736_v1 = vadd.f32 0.0001, %v1712_v63  ;;  %3227 = vmatprep.mubr.msk.f32.mxu1 %vm1583_vm4, %v1866_v52  ;;  %v4279_v21 = vmul.f32 0.03125, %v1616_v54  ;;  %v1793_v31 = vadd.f32 %v4232_v58, %v1774_v11 }
 0x254   : > { %3479 = vrsqrt.f32 %v1735_v20  ;;  %v1794_v61 = vadd.f32 %v4232_v58, %v1775_v18  ;;  %v1701_v40 = vmul.f32 %v4274_v12, %v4274_v12  ;;  %v4302_v9 = vsel %vm1295_vm3, %v2192_v46, %v2193_v17 }
 0x255   : > { %v1829_v6 = vrot.slane %v1804_v49, 7  ;;  %3481 = vrsqrt.f32 %v1736_v1  ;;  %v1673_v0 = vpop.xlane.xlu0 %1672  ;;  %v1805_v30 = vmul.f32 %v1793_v31, %v3708_v14  ;;  %v1702_v19 = vmul.f32 %v4279_v21, %v4279_v21  ;;  %v3013_v1 = vld [vmem:[%s4763_s9 + $0x40] sm:$0xff]  ;;  %v3014_v31 = vld [vmem:[%s4763_s9 + $0x48] sm:$0xff] }
 0x256   : > { %v3476_v44 = vpop.eup %3475  ;;  %v1689_v35 = vmul.f32 0.03125, %v1673_v0  ;;  %v1676_v42 = vpop.xlane.xlu1 %1675  ;;  %v4291_v43 = vmul.f32 %v1794_v61, %v3729_v28  ;;  %v3347_v62 = vpack.c.bf16 %v1856_v10, %v1855_v22 }
 0x257   : > { %v3478_v4 = vpop.eup %3477  ;;  %v1757_v24 = vmul.f32 %v3476_v44, %v1721_v47  ;;  %v1690_v25 = vmul.f32 0.03125, %v1676_v42  ;;  %v4307_v41 = vsel %vm670_vm0, %v1827_v57, %v1829_v6  ;;  %v1831_v48 = vrot.slane %v1805_v30, 7 }
 0x258   : > { %v1758_v5 = vmul.f32 %v3478_v4, %v1722_v13  ;;  %v1713_v56 = vsub.f32 %v1689_v35, %v1701_v40  ;;  %v1867_v16 = vrot.slane %v4307_v41, 1  ;;  %v1833_v46 = vrot.slane %v4291_v43, 7 }
 0x259   : > { %v1776_v29 = vmul.f32 %v4223_v34, %v1757_v24  ;;  %v1714_v51 = vsub.f32 %v1690_v25, %v1702_v19  ;;  %v1619_v60 = vpop.xlane.xlu0 %1618  ;;  %v4318_v54 = vsel %vm670_vm0, %v1829_v6, %v1831_v48  ;;  %v4341_v35 = vpack.c.bf16 %v3014_v31, %v3013_v1 }
 0x25a   : > { %v1777_v11 = vmul.f32 %v4223_v34, %v1758_v5  ;;  %v1737_v63 = vadd.f32 0.0001, %v1713_v56  ;;  %v4313_v37 = vmul.f32 0.03125, %v1619_v60  ;;  %v1679_v18 = vpop.xlane.xlu1 %1678  ;;  %v1868_v57 = vsel %vm1021_vm2, %v1865_v3, %v1867_v16 }
 0x25b   : > { %v1738_v20 = vadd.f32 0.0001, %v1714_v51  ;;  %v1691_v52 = vmul.f32 0.03125, %v1679_v18  ;;  %3228 = vmatmul.mubr.msk.f32.vlgmr.msra.gmra.mrb[6].mxu1 %vm1583_vm4, %v1868_v57  ;;  %v4321_v49 = vsel %vm670_vm0, %v1831_v48, %v1833_v46  ;;  %v1723_v3 = vsub.f32 %v4147_v32, %v4245_v2  ;;  %v4796_v18 = vld [vmem:[#allocation4_spill] sm:$0xff] }
 0x25c   : > { %3483 = vrsqrt.f32 %v1737_v63  ;;  %v1703_v47 = vmul.f32 %v4313_v37, %v4313_v37  ;;  %v1869_v61 = vrot.slane %v4318_v54, 1  ;;  %3346 = vmatpush3.bf16.msra.mxu1 %v4207_v26  ;;  %v1871_v6 = vrot.slane %v4321_v49, 1 }
 0x25d   : > { %3485 = vrsqrt.f32 %v1738_v20  ;;  %v1795_v13 = vadd.f32 %v4232_v58, %v1776_v29  ;;  %v1796_v40 = vadd.f32 %v4232_v58, %v1777_v11  ;;  %3348 = vmatprep.subr.bf16.mxu1 %v3347_v62  ;;  %v1724_v32 = vsub.f32 %v4152_v53, %v4249_v55 }
 0x25e   : > { %v3480_v0 = vpop.eup %3479  ;;  %v1715_v2 = vsub.f32 %v1691_v52, %v1703_v47  ;;  %v1870_v44 = vsel %vm1021_vm2, %v1867_v16, %v1869_v61  ;;  %v1872_v26 = vsel %vm1021_vm2, %v1869_v61, %v1871_v6  ;;  %v1725_v51 = vsub.f32 %v4165_v59, %v4274_v12 }
 0x25f   : > { %v3482_v42 = vpop.eup %3481  ;;  %v1759_v30 = vmul.f32 %v3480_v0, %v1723_v3  ;;  %3230 = vmatprep.mubr.msk.f32.mxu1 %vm1583_vm4, %v1870_v44  ;;  %v1807_v43 = vmul.f32 %v1795_v13, %v3727_v27  ;;  %v1808_v22 = vmul.f32 %v1796_v40, %v3748_v39  ;;  %v1727_v61 = vsub.f32 %v4180_v36, %v4313_v37 }
 0x260   : > { %v1760_v10 = vmul.f32 %v3482_v42, %v1724_v32  ;;  %v1739_v4 = vadd.f32 0.0001, %v1715_v2  ;;  %3231 = vmatmul.mubr.msk.f32.gmra.mrb[8].mxu1 %vm1583_vm4, %v1872_v26  ;;  %v4797_v42 = vld [vmem:[#allocation3_spill] sm:$0xff]  ;;  %v4798_v26 = vld [vmem:[#allocation6_spill] sm:$0xff] }
 0x261   : > { %v1778_v53 = vmul.f32 %v4223_v34, %v1759_v30  ;;  %v1835_v55 = vrot.slane %v1807_v43, 7  ;;  %v1837_v24 = vrot.slane %v1808_v22, 7  ;;  %3350 = vmatpush3.bf16.msra.mxu1 %v3347_v62 }
 0x262   : > { %v1779_v19 = vmul.f32 %v4223_v34, %v1760_v10  ;;  %3487 = vrsqrt.f32 %v1739_v4  ;;  %3352 = vmatprep.subr.bf16.mxu1 %v4341_v35 }
 0x263   : > { %v4352_v25 = vsel %vm670_vm0, %v1833_v46, %v1835_v55  ;;  %v4355_v5 = vsel %vm670_vm0, %v1835_v55, %v1837_v24  ;;  %v1797_v56 = vadd.f32 %v4232_v58, %v1778_v53  ;;  %v1726_v46 = vsub.f32 %v4169_v33, %v4279_v21 }
 0x264   : > { %v1873_v16 = vrot.slane %v4352_v25, 1  ;;  %v1875_v48 = vrot.slane %v4355_v5, 1  ;;  %v1798_v29 = vadd.f32 %v4232_v58, %v1779_v19  ;;  %v4799_v19 = vld [vmem:[#allocation5_spill] sm:$0xff] }
 0x265   : > { %v1809_v60 = vmul.f32 %v1797_v56, %v3746_v38 }
 0x266   : > { %v3484_v62 = vpop.eup %3483  ;;  %v1874_v11 = vsel %vm1021_vm2, %v1871_v6, %v1873_v16  ;;  %v1876_v63 = vsel %vm1021_vm2, %v1873_v16, %v1875_v48  ;;  %v1810_v57 = vmul.f32 %v1798_v29, %v4796_v18 }
 0x267   : > { %v3486_v20 = vpop.eup %3485  ;;  %v1761_v52 = vmul.f32 %v3484_v62, %v1725_v51  ;;  %3233 = vmatprep.mubr.msk.f32.mxu1 %vm1583_vm4, %v1874_v11  ;;  %v1839_v1 = vrot.slane %v1809_v60, 7  ;;  %v3015_v11 = vld [vmem:[%s4763_s9 + $0x50] sm:$0xff] }
 0x268   : > { %v1762_v31 = vmul.f32 %v3486_v20, %v1726_v46  ;;  %3234 = vmatmul.mubr.msk.f32.gmra.mrb[10].mxu1 %vm1583_vm4, %v1876_v63  ;;  %v1841_v59 = vrot.slane %v1810_v57, 7  ;;  %v3016_v63 = vld [vmem:[%s4763_s9 + $0x58] sm:$0xff] }
 0x269   : > { %v1780_v12 = vmul.f32 %v4223_v34, %v1761_v52  ;;  %v4373_v3 = vsel %vm670_vm0, %v1837_v24, %v1839_v1  ;;  %v3355_v57 = vpack.c.bf16 %v3016_v63, %v3015_v11  ;;  %v2199_v52 = vrot.slane %v4321_v49, 2 }
 0x26a   : > { %v1781_v33 = vmul.f32 %v4223_v34, %v1762_v31  ;;  %v1877_v21 = vrot.slane %v4373_v3, 1  ;;  %v4378_v47 = vsel %vm670_vm0, %v1839_v1, %v1841_v59  ;;  %v2201_v31 = vrot.slane %v4352_v25, 2 }
 0x26b   : > { %v1879_v6 = vrot.slane %v4378_v47, 1  ;;  %v1799_v13 = vadd.f32 %v4232_v58, %v1780_v12 }
 0x26c   : > { %v3488_v40 = vpop.eup %3487  ;;  %v1878_v0 = vsel %vm1021_vm2, %v1875_v48, %v1877_v21  ;;  %v1800_v32 = vadd.f32 %v4232_v58, %v1781_v33 }
 0x26d   : > { %v1763_v2 = vmul.f32 %v3488_v40, %v1727_v61  ;;  %3236 = vmatprep.mubr.msk.f32.mxu1 %vm1583_vm4, %v1878_v0  ;;  %v1880_v44 = vsel %vm1021_vm2, %v1877_v21, %v1879_v6  ;;  %v1811_v30 = vmul.f32 %v1799_v13, %v4797_v42  ;;  %v4480_v13 = vld [vmem:[%s4764_s10] ss:$0 sm:$0xff] }
 0x26e   : > { %3237 = vmatmul.mubr.msk.f32.gmra.mrb[12].mxu1 %vm1583_vm4, %v1880_v44  ;;  %v1812_v36 = vmul.f32 %v1800_v32, %v4798_v26 }
 0x26f   : > { %v1782_v37 = vmul.f32 %v4223_v34, %v1763_v2  ;;  %v1843_v43 = vrot.slane %v1811_v30, 7 }
 0x270   : > { %v1845_v22 = vrot.slane %v1812_v36, 7 }
 0x271   : > { %v4393_v10 = vsel %vm670_vm0, %v1841_v59, %v1843_v43  ;;  %v1801_v4 = vadd.f32 %v4232_v58, %v1782_v37 }
 0x272   : > { %v1881_v53 = vrot.slane %v4393_v10, 1  ;;  %v4398_v55 = vsel %vm670_vm0, %v1843_v43, %v1845_v22  ;;  %v2209_v59 = vrot.slane %v4393_v10, 2 }
 0x273   : > { %v1883_v24 = vrot.slane %v4398_v55, 1  ;;  %v1813_v56 = vmul.f32 %v1801_v4, %v4799_v19  ;;  %v2211_v12 = vrot.slane %v4398_v55, 2 }
 0x274   : > { %v1882_v16 = vsel %vm1021_vm2, %v1879_v6, %v1881_v53 }
 0x275   : > { %3239 = vmatprep.mubr.msk.f32.mxu1 %vm1583_vm4, %v1882_v16  ;;  %v1884_v34 = vsel %vm1021_vm2, %v1881_v53, %v1883_v24  ;;  %v1847_v48 = vrot.slane %v1813_v56, 7  ;;  %v2212_v21 = vsel %vm1295_vm3, %v2209_v59, %v2211_v12 }
 0x276   : > { %3240 = vmatmul.mubr.msk.f32.gmra.mrb[14].mxu1 %vm1583_vm4, %v1884_v34 }
 0x277   : > { %v1848_v58 = vsel %vm670_vm0, %v1845_v22, %v1847_v48  ;;  %v1852_v29 = vsel %vm670_vm0, %v1847_v48, 0.0 }
 0x278   : > { %v1885_v51 = vrot.slane %v1848_v58, 1  ;;  %v1887_v60 = vrot.slane %v1852_v29, 1  ;;  %v2213_v33 = vrot.slane %v1848_v58, 2 }
 0x27a   : > { %v1886_v62 = vsel %vm1021_vm2, %v1883_v24, %v1885_v51  ;;  %v1888_v46 = vsel %vm1021_vm2, %v1885_v51, %v1887_v60  ;;  %v2214_v61 = vsel %vm1295_vm3, %v2211_v12, %v2213_v33 }
 0x27b   : > { %3242 = vmatprep.mubr.msk.f32.mxu1 %vm1583_vm4, %v1886_v62 }
 0x27c   : > { %3243 = vmatmul.mubr.msk.f32.gmra.mrb[16].mxu1 %vm1583_vm4, %v1888_v46 }
 0x27d   : > { %3253 = vmatprep.mubr.msk.f32.mxu1 %vm1583_vm4, %v4264_v45  ;;  %v2195_v45 = vrot.slane %v4307_v41, 2 }
 0x27f   : > { %v2196_v20 = vsel %vm1295_vm3, %v2193_v17, %v2195_v45  ;;  %v2205_v17 = vrot.slane %v4373_v3, 2 }
 0x280   : > { %3254 = vmatmul.mubr.msk.f32.vlgmr.msra.gmra.mrb[6].mxu1 %vm1583_vm4, %v4261_v23  ;;  %v2202_v23 = vsel %vm1295_vm3, %v2199_v52, %v2201_v31 }
 0x281   : > { %3354 = vmatpush3.bf16.msra.mxu1 %v4341_v35  ;;  %3256 = vmatprep.mubr.msk.f32.mxu1 %vm1583_vm4, %v4307_v41  ;;  %v2197_v35 = vrot.slane %v4318_v54, 2 }
 0x282   : > { %3356 = vmatprep.subr.bf16.mxu1 %v3355_v57 }
 0x283   : > { %v2198_v1 = vsel %vm1295_vm3, %v2195_v45, %v2197_v35  ;;  %v2200_v41 = vsel %vm1295_vm3, %v2197_v35, %v2199_v52 }
 0x284   : > { %3257 = vmatmul.mubr.msk.f32.gmra.mrb[8].mxu1 %vm1583_vm4, %v4318_v54  ;;  %v2203_v54 = vrot.slane %v4355_v5, 2 }
 0x285   : > { %3259 = vmatprep.mubr.msk.f32.mxu1 %vm1583_vm4, %v4321_v49  ;;  %3358 = vmatpush3.bf16.msra.mxu1 %v3355_v57  ;;  %v2207_v49 = vrot.slane %v4378_v47, 2 }
 0x288   : > { %3260 = vmatmul.mubr.msk.f32.gmra.mrb[10].mxu1 %vm1583_vm4, %v4352_v25  ;;  %v2206_v25 = vsel %vm1295_vm3, %v2203_v54, %v2205_v17 }
 0x289   : > { %3262 = vmatprep.mubr.msk.f32.mxu1 %vm1583_vm4, %v4355_v5  ;;  %v2208_v5 = vsel %vm1295_vm3, %v2205_v17, %v2207_v49 }
 0x28c   : > { %3263 = vmatmul.mubr.msk.f32.gmra.mrb[12].mxu1 %vm1583_vm4, %v4373_v3  ;;  %v2210_v3 = vsel %vm1295_vm3, %v2207_v49, %v2209_v59 }
 0x28d   : > { %3265 = vmatprep.mubr.msk.f32.mxu1 %vm1583_vm4, %v4378_v47  ;;  %v2215_v47 = vrot.slane %v1852_v29, 2 }
 0x28f   : > { %v2216_v6 = vsel %vm1295_vm3, %v2213_v33, %v2215_v47 }
 0x290   : > { %3266 = vmatmul.mubr.msk.f32.gmra.mrb[14].mxu1 %vm1583_vm4, %v4393_v10 }
 0x291   : > { %3268 = vmatprep.mubr.msk.f32.mxu1 %vm1583_vm4, %v4398_v55 }
 0x294   : > { %3269 = vmatmul.mubr.msk.f32.gmra.mrb[16].mxu1 %vm1583_vm4, %v1848_v58 }
 0x295   : > { %3279 = vmatprep.mubr.msk.f32.mxu1 %vm1583_vm4, %v4302_v9  ;;  %v2204_v9 = vsel %vm1295_vm3, %v2201_v31, %v2203_v54 }
 0x298   : > { %3280 = vmatmul.mubr.msk.f32.vlgmr.msra.gmra.mrb[6].mxu1 %vm1583_vm4, %v2196_v20 }
 0x299   : > { %3282 = vmatprep.mubr.msk.f32.mxu1 %vm1583_vm4, %v2198_v1 }
 0x29c   : > { %3283 = vmatmul.mubr.msk.f32.gmra.mrb[8].mxu1 %vm1583_vm4, %v2200_v41 }
 0x29d   : > { %3285 = vmatprep.mubr.msk.f32.mxu1 %vm1583_vm4, %v2202_v23 }
 0x2a0   : > { %3286 = vmatmul.mubr.msk.f32.gmra.mrb[10].mxu1 %vm1583_vm4, %v2204_v9 }
 0x2a1   : > { %3288 = vmatprep.mubr.msk.f32.mxu1 %vm1583_vm4, %v2206_v25 }
 0x2a4   : > { %3289 = vmatmul.mubr.msk.f32.gmra.mrb[12].mxu1 %vm1583_vm4, %v2208_v5 }
 0x2a5   : > { %3291 = vmatprep.mubr.msk.f32.mxu1 %vm1583_vm4, %v2210_v3 }
 0x2a8   : > { %3292 = vmatmul.mubr.msk.f32.gmra.mrb[14].mxu1 %vm1583_vm4, %v2212_v21 }
 0x2a9   : > { %3294 = vmatprep.mubr.msk.f32.mxu1 %vm1583_vm4, %v2214_v61 }
 0x2ac   : > { %3295 = vmatmul.mubr.msk.f32.gmra.mrb[16].mxu1 %vm1583_vm4, %v2216_v6  ;;  %v3513_v6 = vld [vmem:[%s4757_s3] ss:$0 sm:$0xff] }
 0x36b   : > { %v3281_v40 = vpop.f32.mrb[6].mxu1 }
 0x36c   : > { %v2386_v0 = vadd.f32 %v3281_v40, %v4480_v13  ;;  %v2307_v32 = vpop.f32.mrb[7].mxu1 }
 0x36d   : > { %v2385_v2 = vadd.f32 %v4480_v13, %v2307_v32 }
 0x36e   : > { %v2398_v44 = vmax.f32 %v2386_v0, 0.0 }
 0x36f   : > { %v2397_v30 = vmax.f32 %v2385_v2, 0.0  ;;  %v3284_v36 = vpop.f32.mrb[8].mxu1 }
 0x370   : > { %v4485_v37 = vadd.f32 %v4037_v50, %v2398_v44  ;;  %v2388_v43 = vadd.f32 %v3284_v36, %v4480_v13  ;;  %v2317_v22 = vpop.f32.mrb[9].mxu1 }
 0x371   : > { %v4489_v10 = vadd.f32 %v4037_v50, %v2397_v30  ;;  %v2387_v4 = vadd.f32 %v4480_v13, %v2317_v22 }
 0x372   : > { %v2400_v53 = vmax.f32 %v2388_v43, 0.0  ;;  %v2424_v55 = vsel %vm1583_vm4, %v4485_v37, 0.0  ;;  %v2470_v24 = vmul.f32 %v4485_v37, %v4485_v37 }
 0x373   : > { %v2399_v56 = vmax.f32 %v2387_v4, 0.0  ;;  %2425 = vadd.xlane.f32.xlu1 %v2424_v55  ;;  %v3287_v16 = vpop.f32.mrb[10].mxu1  ;;  %v2421_v34 = vsel %vm1583_vm4, %v4489_v10, 0.0  ;;  %v2469_v48 = vmul.f32 %v4489_v10, %v4489_v10 }
 0x374   : > { %2422 = vadd.xlane.f32.xlu0 %v2421_v34  ;;  %v2327_v58 = vpop.f32.mrb[11].mxu1  ;;  %v4501_v29 = vadd.f32 %v4037_v50, %v2400_v53  ;;  %v2390_v51 = vadd.f32 %v3287_v16, %v4480_v13  ;;  %v2484_v60 = vsel %vm1583_vm4, %v2470_v24, 0.0 }
 0x375   : > { %v4506_v62 = vadd.f32 %v4037_v50, %v2399_v56  ;;  %v2389_v46 = vadd.f32 %v4480_v13, %v2327_v58  ;;  %v2481_v63 = vsel %vm1583_vm4, %v2469_v48, 0.0 }
 0x376   : > { %v2402_v45 = vmax.f32 %v2390_v51, 0.0  ;;  %v2430_v35 = vsel %vm1583_vm4, %v4501_v29, 0.0  ;;  %v2472_v20 = vmul.f32 %v4501_v29, %v4501_v29 }
 0x377   : > { %2485 = vadd.xlane.f32.xlu1 %v2484_v60  ;;  %v3290_v11 = vpop.f32.mrb[12].mxu1  ;;  %v2401_v52 = vmax.f32 %v2389_v46, 0.0  ;;  %v2427_v31 = vsel %vm1583_vm4, %v4506_v62, 0.0  ;;  %v2471_v41 = vmul.f32 %v4506_v62, %v4506_v62 }
 0x378   : > { %2482 = vadd.xlane.f32.xlu0 %v2481_v63  ;;  %v2337_v57 = vpop.f32.mrb[13].mxu1  ;;  %v4519_v23 = vadd.f32 %v4037_v50, %v2402_v45  ;;  %v2392_v17 = vadd.f32 %v3290_v11, %v4480_v13  ;;  %v2490_v9 = vsel %vm1583_vm4, %v2472_v20, 0.0 }
 0x379   : > { %v4524_v49 = vadd.f32 %v4037_v50, %v2401_v52  ;;  %v2391_v25 = vadd.f32 %v4480_v13, %v2337_v57  ;;  %v2487_v5 = vsel %vm1583_vm4, %v2471_v41, 0.0 }
 0x37a   : > { %v2404_v3 = vmax.f32 %v2392_v17, 0.0  ;;  %v2436_v33 = vsel %vm1583_vm4, %v4519_v23, 0.0  ;;  %v2474_v21 = vmul.f32 %v4519_v23, %v4519_v23  ;;  %v2652_v17 = vld [vmem:[%s4767_s13 + $0x8] sm:$0xff] }
 0x37b   : > { %2431 = vadd.xlane.f32.xlu1 %v2430_v35  ;;  %v3293_v1 = vpop.f32.mrb[14].mxu1  ;;  %v2403_v47 = vmax.f32 %v2391_v25, 0.0  ;;  %v2433_v50 = vsel %vm1583_vm4, %v4524_v49, 0.0  ;;  %v2473_v61 = vmul.f32 %v4524_v49, %v4524_v49 }
 0x37c   : > { %2428 = vadd.xlane.f32.xlu0 %v2427_v31  ;;  %v2347_v54 = vpop.f32.mrb[15].mxu1  ;;  %v4539_v40 = vadd.f32 %v3513_v6, %v2404_v3  ;;  %v2394_v0 = vadd.f32 %v3293_v1, %v4480_v13  ;;  %v2496_v32 = vsel %vm1583_vm4, %v2474_v21, 0.0 }
 0x37d   : > { %v4543_v2 = vadd.f32 %v3513_v6, %v2403_v47  ;;  %v2393_v44 = vadd.f32 %v4480_v13, %v2347_v54  ;;  %v2493_v30 = vsel %vm1583_vm4, %v2473_v61, 0.0  ;;  %v2651_v54 = vld [vmem:[%s4767_s13] sm:$0xff] }
 0x37e   : > { %v2406_v36 = vmax.f32 %v2394_v0, 0.0  ;;  %v2442_v43 = vsel %vm1583_vm4, %v4539_v40, 0.0  ;;  %v2476_v22 = vmul.f32 %v4539_v40, %v4539_v40  ;;  %v3359_v25 = vpack.c.bf16 %v2652_v17, %v2651_v54 }
 0x37f   : > { %2491 = vadd.xlane.f32.xlu1 %v2490_v9  ;;  %v3296_v59 = vpop.f32.mrb[16].mxu1  ;;  %v2405_v4 = vmax.f32 %v2393_v44, 0.0  ;;  %v2439_v53 = vsel %vm1583_vm4, %v4543_v2, 0.0  ;;  %v2475_v55 = vmul.f32 %v4543_v2, %v4543_v2  ;;  %v2653_v9 = vld [vmem:[%s4767_s13 + $0x10] sm:$0xff] }
 0x380   : > { %2488 = vadd.xlane.f32.xlu0 %v2487_v5  ;;  %v2357_v12 = vpop.f32.mrb[17].mxu1  ;;  %v4555_v24 = vadd.f32 %v3513_v6, %v2406_v36  ;;  %v2396_v56 = vadd.f32 %v3296_v59, %v4480_v13  ;;  %v2502_v16 = vsel %vm1583_vm4, %v2476_v22, 0.0  ;;  %v2654_v59 = vld [vmem:[%s4767_s13 + $0x18] sm:$0xff]  ;;  %3360 = vmatprep.subr.bf16.mxu0 %v3359_v25 }
 0x381   : > { %v4559_v34 = vadd.f32 %v3513_v6, %v2405_v4  ;;  %v2395_v48 = vadd.f32 %v4480_v13, %v2357_v12  ;;  %v2499_v58 = vsel %vm1583_vm4, %v2475_v55, 0.0  ;;  %v3363_v12 = vpack.c.bf16 %v2654_v59, %v2653_v9  ;;  %3362 = vmatpush3.bf16.msra.mxu0 %v3359_v25  ;;  %v4616_v59 = vld [vmem:[%s4765_s11] ss:$0 sm:$0xff] }
 0x382   : > { %v2408_v51 = vmax.f32 %v2396_v56, 0.0  ;;  %v2448_v60 = vsel %vm1583_vm4, %v4555_v24, 0.0  ;;  %v2478_v46 = vmul.f32 %v4555_v24, %v4555_v24 }
 0x383   : > { %2437 = vadd.xlane.f32.xlu1 %v2436_v33  ;;  %v2407_v11 = vmax.f32 %v2395_v48, 0.0  ;;  %v2445_v63 = vsel %vm1583_vm4, %v4559_v34, 0.0  ;;  %v2477_v57 = vmul.f32 %v4559_v34, %v4559_v34  ;;  %3364 = vmatprep.subr.bf16.mxu0 %v3363_v12 }
 0x384   : > { %2434 = vadd.xlane.f32.xlu0 %v2433_v50  ;;  %v4571_v13 = vadd.f32 %v3513_v6, %v2408_v51  ;;  %v2508_v45 = vsel %vm1583_vm4, %v2478_v46, 0.0 }
 0x385   : > { %v4574_v35 = vadd.f32 %v3513_v6, %v2407_v11  ;;  %v2505_v20 = vsel %vm1583_vm4, %v2477_v57, 0.0  ;;  %3366 = vmatpush3.bf16.msra.mxu0 %v3363_v12 }
 0x386   : > { %v2454_v52 = vsel %vm1583_vm4, %v4571_v13, 0.0  ;;  %v2480_v1 = vmul.f32 %v4571_v13, %v4571_v13 }
 0x387   : > { %2497 = vadd.xlane.f32.xlu1 %v2496_v32  ;;  %v2451_v31 = vsel %vm1583_vm4, %v4574_v35, 0.0  ;;  %v2479_v41 = vmul.f32 %v4574_v35, %v4574_v35 }
 0x388   : > { %2494 = vadd.xlane.f32.xlu0 %v2493_v30  ;;  %v2514_v5 = vsel %vm1583_vm4, %v2480_v1, 0.0 }
 0x389   : > { %v2511_v3 = vsel %vm1583_vm4, %v2479_v41, 0.0 }
 0x38b   : > { %2443 = vadd.xlane.f32.xlu1 %v2442_v43 }
 0x38c   : > { %2440 = vadd.xlane.f32.xlu0 %v2439_v53 }
 0x38f   : > { %2503 = vadd.xlane.f32.xlu1 %v2502_v16 }
 0x390   : > { %2500 = vadd.xlane.f32.xlu0 %v2499_v58 }
 0x393   : > { %2449 = vadd.xlane.f32.xlu1 %v2448_v60 }
 0x394   : > { %2446 = vadd.xlane.f32.xlu0 %v2445_v63 }
 0x397   : > { %2509 = vadd.xlane.f32.xlu1 %v2508_v45 }
 0x398   : > { %2506 = vadd.xlane.f32.xlu0 %v2505_v20 }
 0x39b   : > { %2455 = vadd.xlane.f32.xlu1 %v2454_v52 }
 0x39c   : > { %2452 = vadd.xlane.f32.xlu0 %v2451_v31 }
 0x39f   : > { %2515 = vadd.xlane.f32.xlu1 %v2514_v5 }
 0x3a0   : > { %2512 = vadd.xlane.f32.xlu0 %v2511_v3 }
 0x400   : > { %v2426_v33 = vpop.xlane.xlu1 %2425 }
 0x401   : > { %v2458_v21 = vmul.f32 0.03125, %v2426_v33  ;;  %v2423_v47 = vpop.xlane.xlu0 %2422 }
 0x402   : > { %v2457_v50 = vmul.f32 0.03125, %v2423_v47 }
 0x403   : > { %v2530_v6 = vmul.f32 %v2458_v21, %v2458_v21  ;;  %v2554_v54 = vsub.f32 %v4485_v37, %v2458_v21 }
 0x404   : > { %v2486_v61 = vpop.xlane.xlu1 %2485  ;;  %v2529_v44 = vmul.f32 %v2457_v50, %v2457_v50  ;;  %v2553_v25 = vsub.f32 %v4489_v10, %v2457_v50  ;;  %v4625_v10 = vld [vmem:[%s4766_s12] ss:$0 sm:$0xff] }
 0x405   : > { %v2518_v0 = vmul.f32 0.03125, %v2486_v61  ;;  %v2483_v32 = vpop.xlane.xlu0 %2482 }
 0x406   : > { %v2517_v30 = vmul.f32 0.03125, %v2483_v32 }
 0x407   : > { %v2542_v36 = vsub.f32 %v2518_v0, %v2530_v6 }
 0x408   : > { %v2541_v43 = vsub.f32 %v2517_v30, %v2529_v44  ;;  %v2432_v22 = vpop.xlane.xlu1 %2431 }
 0x409   : > { %v2566_v4 = vadd.f32 0.0001, %v2542_v36  ;;  %v4599_v53 = vmul.f32 0.03125, %v2432_v22  ;;  %v2429_v55 = vpop.xlane.xlu0 %2428 }
 0x40a   : > { %v2565_v56 = vadd.f32 0.0001, %v2541_v43  ;;  %v4601_v16 = vmul.f32 0.03125, %v2429_v55 }
 0x40b   : > { %3489 = vrsqrt.f32 %v2566_v4  ;;  %v2532_v58 = vmul.f32 %v4599_v53, %v4599_v53 }
 0x40c   : > { %3491 = vrsqrt.f32 %v2565_v56  ;;  %v2492_v48 = vpop.xlane.xlu1 %2491  ;;  %v2531_v46 = vmul.f32 %v4601_v16, %v4601_v16 }
 0x40d   : > { %v2520_v51 = vmul.f32 0.03125, %v2492_v48  ;;  %v2489_v60 = vpop.xlane.xlu0 %2488  ;;  %v2556_v48 = vsub.f32 %v4501_v29, %v4599_v53 }
 0x40e   : > { %v2519_v11 = vmul.f32 0.03125, %v2489_v60  ;;  %v2555_v60 = vsub.f32 %v4506_v62, %v4601_v16 }
 0x40f   : > { %v2544_v63 = vsub.f32 %v2520_v51, %v2532_v58 }
 0x410   : > { %v2543_v57 = vsub.f32 %v2519_v11, %v2531_v46  ;;  %v2438_v45 = vpop.xlane.xlu1 %2437 }
 0x411   : > { %v2568_v20 = vadd.f32 0.0001, %v2544_v63  ;;  %v4607_v52 = vmul.f32 0.03125, %v2438_v45  ;;  %v2435_v1 = vpop.xlane.xlu0 %2434 }
 0x412   : > { %v2567_v31 = vadd.f32 0.0001, %v2543_v57  ;;  %v4609_v41 = vmul.f32 0.03125, %v2435_v1 }
 0x413   : > { %3493 = vrsqrt.f32 %v2568_v20  ;;  %v2534_v5 = vmul.f32 %v4607_v52, %v4607_v52 }
 0x414   : > { %3495 = vrsqrt.f32 %v2567_v31  ;;  %v2498_v17 = vpop.xlane.xlu1 %2497  ;;  %v2533_v37 = vmul.f32 %v4609_v41, %v4609_v41 }
 0x415   : > { %v3490_v9 = vpop.eup %3489  ;;  %v2522_v12 = vmul.f32 0.03125, %v2498_v17  ;;  %v2495_v3 = vpop.xlane.xlu0 %2494 }
 0x416   : > { %v3492_v33 = vpop.eup %3491  ;;  %v2590_v47 = vmul.f32 %v3490_v9, %v2554_v54  ;;  %v2521_v21 = vmul.f32 0.03125, %v2495_v3 }
 0x417   : > { %v2546_v50 = vsub.f32 %v2522_v12, %v2534_v5  ;;  %v2589_v61 = vmul.f32 %v3492_v33, %v2553_v25 }
 0x418   : > { %v2609_v6 = vmul.f32 %v4616_v59, %v2590_v47  ;;  %v2545_v0 = vsub.f32 %v2521_v21, %v2533_v37  ;;  %v2444_v32 = vpop.xlane.xlu1 %2443  ;;  %v2558_v47 = vsub.f32 %v4519_v23, %v4607_v52 }
 0x419   : > { %v2570_v44 = vadd.f32 0.0001, %v2546_v50  ;;  %v4628_v30 = vmul.f32 0.03125, %v2444_v32  ;;  %v2441_v36 = vpop.xlane.xlu0 %2440  ;;  %v2608_v43 = vmul.f32 %v4616_v59, %v2589_v61  ;;  %v2557_v50 = vsub.f32 %v4524_v49, %v4609_v41 }
 0x41a   : > { %v2628_v22 = vadd.f32 %v4625_v10, %v2609_v6  ;;  %v2569_v4 = vadd.f32 0.0001, %v2545_v0  ;;  %v4632_v55 = vmul.f32 0.03125, %v2441_v36 }
 0x41b   : > { %3497 = vrsqrt.f32 %v2570_v44  ;;  %v2627_v56 = vadd.f32 %v4625_v10, %v2608_v43  ;;  %v2536_v46 = vmul.f32 %v4628_v30, %v4628_v30 }
 0x41c   : > { %3499 = vrsqrt.f32 %v2569_v4  ;;  %v2504_v58 = vpop.xlane.xlu1 %2503  ;;  %v2535_v20 = vmul.f32 %v4632_v55, %v4632_v55  ;;  %v2640_v29 = vmul.f32 %v2628_v22, %v3710_v15 }
 0x41d   : > { %v3494_v51 = vpop.eup %3493  ;;  %v2524_v11 = vmul.f32 0.03125, %v2504_v58  ;;  %v2501_v63 = vpop.xlane.xlu0 %2500  ;;  %v2639_v57 = vmul.f32 %v2627_v56, %v3702_v8 }
 0x41e   : > { %v3496_v45 = vpop.eup %3495  ;;  %v2523_v1 = vmul.f32 0.03125, %v2501_v63  ;;  %v2592_v53 = vmul.f32 %v3494_v51, %v2556_v48  ;;  %v2560_v63 = vsub.f32 %v4539_v40, %v4628_v30 }
 0x41f   : > { %v2548_v31 = vsub.f32 %v2524_v11, %v2536_v46  ;;  %3305 = vmatprep.mubr.msk.f32.mxu0 %vm1583_vm4, %v2639_v57  ;;  %v2591_v54 = vmul.f32 %v3496_v45, %v2555_v60 }
 0x420   : > { %v2547_v62 = vsub.f32 %v2523_v1, %v2535_v20  ;;  %3306 = vmatmul.mubr.msk.f32.vlgmr.msra.gmra.mrb[12].mxu0 %vm1583_vm4, %v2640_v29  ;;  %v2450_v16 = vpop.xlane.xlu1 %2449  ;;  %v2611_v17 = vmul.f32 %v4616_v59, %v2592_v53  ;;  %v2559_v20 = vsub.f32 %v4543_v2, %v4632_v55 }
 0x421   : > { %v2572_v9 = vadd.f32 0.0001, %v2548_v31  ;;  %v4648_v8 = vmul.f32 0.03125, %v2450_v16  ;;  %v2447_v25 = vpop.xlane.xlu0 %2446  ;;  %v2610_v5 = vmul.f32 %v4616_v59, %v2591_v54 }
 0x422   : > { %v2571_v12 = vadd.f32 0.0001, %v2547_v62  ;;  %v4651_v3 = vmul.f32 0.03125, %v2447_v25  ;;  %v2630_v15 = vadd.f32 %v4625_v10, %v2611_v17 }
 0x423   : > { %3501 = vrsqrt.f32 %v2572_v9  ;;  %v2629_v33 = vadd.f32 %v4625_v10, %v2610_v5  ;;  %v2538_v61 = vmul.f32 %v4648_v8, %v4648_v8 }
 0x424   : > { %3503 = vrsqrt.f32 %v2571_v12  ;;  %v2510_v37 = vpop.xlane.xlu1 %2509  ;;  %v2537_v36 = vmul.f32 %v4651_v3, %v4651_v3  ;;  %v2642_v23 = vmul.f32 %v2630_v15, %v3708_v14 }
 0x425   : > { %v3498_v21 = vpop.eup %3497  ;;  %v2526_v6 = vmul.f32 0.03125, %v2510_v37  ;;  %v2507_v0 = vpop.xlane.xlu0 %2506  ;;  %v2641_v32 = vmul.f32 %v2629_v33, %v3700_v7 }
 0x426   : > { %v3500_v44 = vpop.eup %3499  ;;  %v2525_v43 = vmul.f32 0.03125, %v2507_v0  ;;  %v2594_v52 = vmul.f32 %v3498_v21, %v2558_v47  ;;  %v2561_v47 = vsub.f32 %v4559_v34, %v4651_v3 }
 0x427   : > { %v2550_v22 = vsub.f32 %v2526_v6, %v2538_v61  ;;  %3308 = vmatprep.mubr.msk.f32.mxu0 %vm1583_vm4, %v2641_v32  ;;  %v2593_v4 = vmul.f32 %v3500_v44, %v2557_v50 }
 0x428   : > { %v2549_v49 = vsub.f32 %v2525_v43, %v2537_v36  ;;  %3309 = vmatmul.mubr.msk.f32.gmra.mrb[14].mxu0 %vm1583_vm4, %v2642_v23  ;;  %v2456_v41 = vpop.xlane.xlu1 %2455  ;;  %v2613_v56 = vmul.f32 %v4616_v59, %v2594_v52 }
 0x429   : > { %v2574_v48 = vadd.f32 0.0001, %v2550_v22  ;;  %v2468_v7 = vmul.f32 0.03125, %v2456_v41  ;;  %v2453_v58 = vpop.xlane.xlu0 %2452  ;;  %v2612_v51 = vmul.f32 %v4616_v59, %v2593_v4  ;;  %v3032_v4 = vld [vmem:[#allocation2] ss:$0 sm:$0xff] }
 0x42a   : > { %v2573_v60 = vadd.f32 0.0001, %v2549_v49  ;;  %v2467_v46 = vmul.f32 0.03125, %v2453_v58  ;;  %v2632_v14 = vadd.f32 %v4625_v10, %v2613_v56 }
 0x42b   : > { %3505 = vrsqrt.f32 %v2574_v48  ;;  %v2631_v11 = vadd.f32 %v4625_v10, %v2612_v51  ;;  %v2540_v1 = vmul.f32 %v2468_v7, %v2468_v7  ;;  %v2564_v34 = vsub.f32 %v4571_v13, %v2468_v7 }
 0x42c   : > { %3507 = vrsqrt.f32 %v2573_v60  ;;  %v2516_v57 = vpop.xlane.xlu1 %2515  ;;  %v2539_v62 = vmul.f32 %v2467_v46, %v2467_v46  ;;  %v2644_v17 = vmul.f32 %v2632_v14, %v3727_v27  ;;  %v2562_v27 = vsub.f32 %v4555_v24, %v4648_v8 }
 0x42d   : > { %v3502_v45 = vpop.eup %3501  ;;  %v2528_v29 = vmul.f32 0.03125, %v2516_v57  ;;  %v2513_v53 = vpop.xlane.xlu0 %2512  ;;  %v2643_v31 = vmul.f32 %v2631_v11, %v3729_v28  ;;  %v2563_v3 = vsub.f32 %v4574_v35, %v2467_v46  ;;  %v3516_v46 = vld [vmem:[%s3632_s24 + $0x18] sm:$0xff]  ;;  %v3517_v11 = vld [vmem:[%s3632_s24 + $0x10] sm:$0xff] }
 0x42e   : > { %v3504_v54 = vpop.eup %3503  ;;  %v2527_v16 = vmul.f32 0.03125, %v2513_v53  ;;  %v2596_v9 = vmul.f32 %v3502_v45, %v2560_v63 }
 0x42f   : > { %v2552_v25 = vsub.f32 %v2528_v29, %v2540_v1  ;;  %3311 = vmatprep.mubr.msk.f32.mxu0 %vm1583_vm4, %v2643_v31  ;;  %v2595_v40 = vmul.f32 %v3504_v54, %v2559_v20  ;;  %v3518_v29 = vld [vmem:[%s3632_s24 + $0x28] sm:$0xff]  ;;  %v3519_v31 = vld [vmem:[%s3632_s24 + $0x20] sm:$0xff] }
 0x430   : > { %v2551_v30 = vsub.f32 %v2527_v16, %v2539_v62  ;;  %3312 = vmatmul.mubr.msk.f32.gmra.mrb[16].mxu0 %vm1583_vm4, %v2644_v17  ;;  %v2615_v2 = vmul.f32 %v4616_v59, %v2596_v9 }
 0x431   : > { %v2576_v55 = vadd.f32 0.0001, %v2552_v25  ;;  %v2614_v5 = vmul.f32 %v4616_v59, %v2595_v40  ;;  %v3520_v25 = vld [vmem:[%s3632_s24 + $0x38] sm:$0xff] }
 0x432   : > { %v2575_v12 = vadd.f32 0.0001, %v2551_v30  ;;  %v2634_v28 = vadd.f32 %v4625_v10, %v2615_v2  ;;  %v3521_v30 = vld [vmem:[%s3632_s24 + $0x30] sm:$0xff] }
 0x433   : > { %3509 = vrsqrt.f32 %v2576_v55  ;;  %v2633_v15 = vadd.f32 %v4625_v10, %v2614_v5 }
 0x434   : > { %3511 = vrsqrt.f32 %v2575_v12  ;;  %v2646_v50 = vmul.f32 %v2634_v28, %v3746_v38 }
 0x435   : > { %v3506_v33 = vpop.eup %3505  ;;  %v2645_v37 = vmul.f32 %v2633_v15, %v3748_v39  ;;  %v3522_v15 = vld [vmem:[%s3632_s24 + $0x48] sm:$0xff] }
 0x436   : > { %v3508_v21 = vpop.eup %3507  ;;  %v2598_v61 = vmul.f32 %v3506_v33, %v2562_v27  ;;  %v3523_v33 = vld [vmem:[%s3632_s24 + $0x40] sm:$0xff] }
 0x437   : > { %3314 = vmatprep.mubr.msk.f32.mxu0 %vm1583_vm4, %v2645_v37  ;;  %v2597_v6 = vmul.f32 %v3508_v21, %v2561_v47 }
 0x438   : > { %3315 = vmatmul.mubr.msk.f32.gmra.mrb[18].mxu0 %vm1583_vm4, %v2646_v50  ;;  %v2617_v0 = vmul.f32 %v4616_v59, %v2598_v61 }
 0x439   : > { %v2616_v24 = vmul.f32 %v4616_v59, %v2597_v6  ;;  %v3524_v6 = vld [vmem:[%s3632_s24 + $0x58] sm:$0xff] }
 0x43a   : > { %v2636_v8 = vadd.f32 %v4625_v10, %v2617_v0 }
 0x43b   : > { %v2635_v32 = vadd.f32 %v4625_v10, %v2616_v24  ;;  %v3525_v24 = vld [vmem:[%s3632_s24 + $0x50] sm:$0xff] }
 0x43c   : > { %v2648_v36 = vmul.f32 %v2636_v8, %v4797_v42 }
 0x43d   : > { %v3510_v39 = vpop.eup %3509  ;;  %v2647_v38 = vmul.f32 %v2635_v32, %v4796_v18 }
 0x43e   : > { %v3512_v44 = vpop.eup %3511  ;;  %v2600_v43 = vmul.f32 %v3510_v39, %v2564_v34 }
 0x43f   : > { %3317 = vmatprep.mubr.msk.f32.mxu0 %vm1583_vm4, %v2647_v38  ;;  %v2599_v23 = vmul.f32 %v3512_v44, %v2563_v3 }
 0x440   : > { %3318 = vmatmul.mubr.msk.f32.gmra.mrb[20].mxu0 %vm1583_vm4, %v2648_v36  ;;  %v2619_v52 = vmul.f32 %v4616_v59, %v2600_v43 }
 0x441   : > { %v2618_v13 = vmul.f32 %v4616_v59, %v2599_v23 }
 0x442   : > { %v2638_v35 = vadd.f32 %v4625_v10, %v2619_v52 }
 0x443   : > { %v2637_v18 = vadd.f32 %v4625_v10, %v2618_v13  ;;  %v3515_v10 = vld [vmem:[%s3632_s24] sm:$0xff] }
 0x444   : > { %v2650_v42 = vmul.f32 %v2638_v35, %v4799_v19  ;;  %v3514_v19 = vld [vmem:[%s3632_s24 + $0x8] sm:$0xff] }
 0x445   : > { %v2649_v22 = vmul.f32 %v2637_v18, %v4798_v26 }
 0x447   : > { %3320 = vmatprep.mubr.msk.f32.mxu0 %vm1583_vm4, %v2649_v22 }
 0x448   : > { %3321 = vmatmul.mubr.msk.f32.gmra.mrb[22].mxu0 %vm1583_vm4, %v2650_v42 }
 0x4f3   : > { %v3307_v49 = vpop.f32.mrb[12].mxu0 }
 0x4f4   : > { %v2770_v41 = vadd.f32 %v3307_v49, %v3032_v4  ;;  %v2764_v56 = vpop.f32.mrb[13].mxu0 }
 0x4f5   : > { %v2765_v26 = vadd.f32 %v3032_v4, %v2764_v56 }
 0x4f6   : > { %v2824_v59 = vmul.f32 %v3514_v19, %v2770_v41 }
 0x4f7   : > { %v2823_v48 = vmul.f32 %v3515_v10, %v2765_v26 }
 0x4f8   : > { %2837 = vst.msk [vmem:[%s4713_s19 + $0x8] sm:$0xff] %vm2835_vm5, %v2824_v59 }
 0x4f9   : > { %2836 = vst.msk [vmem:[%s4713_s19] sm:$0xff] %vm2835_vm5, %v2823_v48 }
 0x4fb   : > { %v3310_v7 = vpop.f32.mrb[14].mxu0 }
 0x4fc   : > { %v2780_v58 = vadd.f32 %v3310_v7, %v3032_v4  ;;  %v2774_v51 = vpop.f32.mrb[15].mxu0 }
 0x4fd   : > { %v2775_v60 = vadd.f32 %v3032_v4, %v2774_v51 }
 0x4fe   : > { %v2826_v14 = vmul.f32 %v3516_v46, %v2780_v58 }
 0x4ff   : > { %v2825_v63 = vmul.f32 %v3517_v11, %v2775_v60 }
 0x500   : > { %2839 = vst.msk [vmem:[%s4713_s19 + $0x18] sm:$0xff] %vm2835_vm5, %v2826_v14 }
 0x501   : > { %2838 = vst.msk [vmem:[%s4713_s19 + $0x10] sm:$0xff] %vm2835_vm5, %v2825_v63 }
 0x503   : > { %v3313_v57 = vpop.f32.mrb[16].mxu0 }
 0x504   : > { %v2790_v45 = vadd.f32 %v3313_v57, %v3032_v4  ;;  %v2784_v20 = vpop.f32.mrb[17].mxu0 }
 0x505   : > { %v2785_v1 = vadd.f32 %v3032_v4, %v2784_v20 }
 0x506   : > { %v2828_v53 = vmul.f32 %v3518_v29, %v2790_v45 }
 0x507   : > { %v2827_v54 = vmul.f32 %v3519_v31, %v2785_v1 }
 0x508   : > { %2841 = vst.msk [vmem:[%s4713_s19 + $0x28] sm:$0xff] %vm2835_vm5, %v2828_v53 }
 0x509   : > { %2840 = vst.msk [vmem:[%s4713_s19 + $0x20] sm:$0xff] %vm2835_vm5, %v2827_v54 }
 0x50b   : > { %v3316_v62 = vpop.f32.mrb[18].mxu0 }
 0x50c   : > { %v2800_v16 = vadd.f32 %v3316_v62, %v3032_v4  ;;  %v2794_v17 = vpop.f32.mrb[19].mxu0 }
 0x50d   : > { %v2795_v9 = vadd.f32 %v3032_v4, %v2794_v17 }
 0x50e   : > { %v2830_v40 = vmul.f32 %v3520_v25, %v2800_v16 }
 0x50f   : > { %v2829_v2 = vmul.f32 %v3521_v30, %v2795_v9 }
 0x510   : > { %2843 = vst.msk [vmem:[%s4713_s19 + $0x38] sm:$0xff] %vm2835_vm5, %v2830_v40 }
 0x511   : > { %2842 = vst.msk [vmem:[%s4713_s19 + $0x30] sm:$0xff] %vm2835_vm5, %v2829_v2 }
 0x513   : > { %v3319_v55 = vpop.f32.mrb[20].mxu0 }
 0x514   : > { %v2810_v5 = vadd.f32 %v3319_v55, %v3032_v4  ;;  %v2804_v12 = vpop.f32.mrb[21].mxu0 }
 0x515   : > { %v2805_v28 = vadd.f32 %v3032_v4, %v2804_v12 }
 0x516   : > { %v2832_v27 = vmul.f32 %v3522_v15, %v2810_v5 }
 0x517   : > { %v2831_v47 = vmul.f32 %v3523_v33, %v2805_v28 }
 0x518   : > { %2845 = vst.msk [vmem:[%s4713_s19 + $0x48] sm:$0xff] %vm2835_vm5, %v2832_v27 }
 0x519   : > { %2844 = vst.msk [vmem:[%s4713_s19 + $0x40] sm:$0xff] %vm2835_vm5, %v2831_v47 }
 0x51b   : > { %v3322_v37 = vpop.f32.mrb[22].mxu0 }
 0x51c   : > { %v2820_v21 = vadd.f32 %v3322_v37, %v3032_v4  ;;  %v2814_v50 = vpop.f32.mrb[23].mxu0 }
 0x51d   : > { %v2815_v61 = vadd.f32 %v3032_v4, %v2814_v50 }
 0x51e   : > { %v2834_v0 = vmul.f32 %v3524_v6, %v2820_v21 }
 0x51f   : > { %v2833_v8 = vmul.f32 %v3525_v24, %v2815_v61 }
 0x520   : > { %2847 = vst.msk [vmem:[%s4713_s19 + $0x58] sm:$0xff] %vm2835_vm5, %v2834_v0 }
 0x521   : > { %2846 = vst.msk [vmem:[%s4713_s19 + $0x50] sm:$0xff] %vm2835_vm5, %v2833_v8 }
 0x522 PF: > { %s27_s20 = sadd.s32 1, %s3532_s20  }
 0x523   : > { %p24_p4 = scmp.ge.s32.totalorder %s27_s20, 4  }
 0x525   :  { %26 = sbr.rel (!%p24_p4) target bundleno = 3 (0x3), region = 122 }

</bundles_post_ra>
